<compile_context>
chip_gen: v7x
topology: tpu7x:2x2x1
jax: 0.10.0
libtpu: 0.0.40
codegen_flags: <defaults>
</compile_context>

<pallas_src>
import functools

import jax
import jax.numpy as jnp
from jax.experimental import pallas as pl
from jax.experimental.pallas import tpu as pltpu


# ----------------------------------------------------------------------------
# Fused Pallas kernel: BiLSTM recurrence + hidden2tag + argmax
# ----------------------------------------------------------------------------
def _bilstm_tag_kernel(x_ref, wih_ref, whh_ref, w2t_ref, b2t_ref, out_ref,
                       preb_scr, hf_scr, hb_scr, *, T, Bs, H):
    """One batch shard, everything resident in VMEM.

    x_ref    : (T*Bs, K2)  f32  [x_fwd | x_rev | 1 | pad] time-major rows (t*Bs + b)
    wih_ref  : (K2, 8H)    f32  column-masked fused input->gate weights (+bias row)
    whh_ref  : (2H, 8H)    f32  block-diag fused hidden->gate weights
    w2t_ref  : (2H, L)     f32  hidden2tag weight (rows = [fwd | bwd] features)
    b2t_ref  : (1, L)      f32  hidden2tag bias
    out_ref  : (T*Bs, 128) i32  argmax tag broadcast across lanes (lane 0 is used)
    preb_scr : (T*Bs, 8H)  f32  blended pre-gates scratch
    hf_scr   : (T*Bs, H)   f32  forward hidden states (position order)
    hb_scr   : (T*Bs, H)   f32  backward hidden states (position order)
    """
    TH = 2 * H           # state width (both directions)
    G = 8 * H            # fused gate slab width
    TB = T * Bs

    # ---- prologue: ONE fat MXU matmul -> time-blended pre-gates, bias folded in ----
    preb_scr[...] = jnp.dot(x_ref[...], wih_ref[...],
                            preferred_element_type=jnp.float32)      # (TB, G)

    whh = whh_ref[...]                                               # (2H, G)

    h = jnp.zeros((Bs, TH), jnp.float32)     # [h_fwd | h_bwd]
    c = jnp.zeros((Bs, TH), jnp.float32)

    # Statically unrolled recurrence (T is small & compile-time constant here).
    # Step s advances the forward LSTM at position s and the backward LSTM at
    # position T-1-s simultaneously (the blended pre-gate row block already
    # carries the right positions for each direction's columns).
    for s in range(T):
        gates = preb_scr[s * Bs:(s + 1) * Bs, :] + jnp.dot(
            h, whh, preferred_element_type=jnp.float32)              # (Bs, G)

        # column layout: [i | f | o] (sigmoid, 3*TH lanes) then [g] (tanh, TH lanes)
        sfo = jax.nn.sigmoid(gates[:, 0:3 * TH])     # one EUP push for i,f,o
        i_g = sfo[:, 0:TH]
        f_g = sfo[:, TH:2 * TH]
        o_g = sfo[:, 2 * TH:3 * TH]
        g_g = jnp.tanh(gates[:, 3 * TH:4 * TH])

        c = f_g * c + i_g * g_g
        h = o_g * jnp.tanh(c)

        hf_scr[s * Bs:(s + 1) * Bs, :] = h[:, 0:H]                   # position s
        hb_scr[(T - 1 - s) * Bs:(T - s) * Bs, :] = h[:, H:TH]        # position T-1-s

    # ---- epilogue: hidden2tag + argmax; features never leave VMEM ----
    logits = (jnp.dot(hf_scr[...], w2t_ref[0:H, :],
                      preferred_element_type=jnp.float32)
              + jnp.dot(hb_scr[...], w2t_ref[H:TH, :],
                        preferred_element_type=jnp.float32)
              + b2t_ref[...])                                        # (TB, L)
    L = logits.shape[1]
    m = jnp.max(logits, axis=1, keepdims=True)
    lane = jax.lax.broadcasted_iota(jnp.int32, logits.shape, 1).astype(jnp.float32)
    first_max = jnp.min(jnp.where(logits >= m, lane, float(L)),
                        axis=1, keepdims=True)                       # first argmax
    tags = first_max.astype(jnp.int32)                               # (TB, 1)
    # lane-dense output: broadcast the tag across all 128 lanes (unmasked vst)
    out_ref[...] = jnp.broadcast_to(tags, (TB, 128))


# ----------------------------------------------------------------------------
# Weight packing helpers
# ----------------------------------------------------------------------------
def _round_up(x, m):
    return (x + m - 1) // m * m


def _pack_gate_cols(w_f, w_b):
    """(R,4H) fwd, (R,4H) bwd in torch gate order [i,f,g,o] ->
    (R,8H) fused columns [i_f,i_b, f_f,f_b, o_f,o_b, g_f,g_b]
    (all sigmoid gates contiguous first, tanh gate last)."""
    R, H4 = w_f.shape
    H = H4 // 4
    perm = jnp.array([0, 1, 3, 2])          # i,f,g,o -> i,f,o,g
    wf = w_f.reshape(R, 4, H)[:, perm, :]
    wb = w_b.reshape(R, 4, H)[:, perm, :]
    return jnp.stack([wf, wb], axis=2).reshape(R, 8 * H)


# ----------------------------------------------------------------------------
# Forward wrapper (reproduces BiLSTM.forward eval decode path)
# ----------------------------------------------------------------------------
@jax.jit
def bilstm_forward(params, word_inputs, biword_inputs, mask):
    """word_inputs / biword_inputs: (B, T) int32; mask: (B, T) -> decode (B, T) int32."""
    B, T = word_inputs.shape
    H = params["fwd_w_hh"].shape[0]             # per-direction hidden size
    L = params["h2t_w"].shape[1]
    G = 8 * H

    # --- embedding lookups (self.drop is identity in eval) --------------------
    we = jnp.take(params["word_emb"], word_inputs, axis=0)            # (B,T,Dw)
    be = jnp.take(params["biword_emb"], biword_inputs, axis=0)        # (B,T,Db)
    embs = jnp.concatenate([we, be], axis=2).astype(jnp.float32)      # (B,T,D)
    D = embs.shape[2]

    # --- batch padding / sharding (M dim of the recurrent matmul) -------------
    if B <= 128:
        Bs = max(8, _round_up(B, 8))    # fill sublanes (review: pad B to >= 8)
        NS = 1
    else:
        Bs = 128                        # fill MXU rows; extra shards -> parallel grid
        NS = -(-B // Bs)
    Bpad = NS * Bs
    embs_p = jnp.pad(embs, ((0, Bpad - B), (0, 0), (0, 0)))

    # time-major per-shard slabs; backward direction time-reversal is a wrapper flip
    x_tm = jnp.transpose(embs_p.reshape(NS, Bs, T, D), (0, 2, 1, 3))  # (NS,T,Bs,D)
    x_rev = x_tm[:, ::-1]
    ones = jnp.ones((NS, T, Bs, 1), jnp.float32)
    K_raw = 2 * D + 1
    x2 = jnp.concatenate([x_tm, x_rev, ones], axis=3).reshape(NS, T * Bs, K_raw)
    K2 = _round_up(K_raw, 8)
    x2 = jnp.pad(x2, ((0, 0), (0, 0), (0, K2 - K_raw)))

    # --- fused weight packing --------------------------------------------------
    z_ih = jnp.zeros_like(params["fwd_w_ih"])
    wih_fcols = _pack_gate_cols(params["fwd_w_ih"], z_ih)       # fwd columns only
    wih_bcols = _pack_gate_cols(z_ih, params["bwd_w_ih"])       # bwd columns only
    b_row = _pack_gate_cols(params["fwd_b"].reshape(1, -1),
                            params["bwd_b"].reshape(1, -1))     # (1, G)
    wih2 = jnp.concatenate([wih_fcols, wih_bcols, b_row], axis=0)     # (2D+1, G)
    wih2 = jnp.pad(wih2, ((0, K2 - K_raw), (0, 0)))

    z_hh = jnp.zeros_like(params["fwd_w_hh"])
    whh = _pack_gate_cols(
        jnp.concatenate([params["fwd_w_hh"], z_hh], axis=0),
        jnp.concatenate([z_hh, params["bwd_w_hh"]], axis=0))          # (2H, G)

    w2t = params["h2t_w"].astype(jnp.float32)                          # (2H, L)
    b2t = params["h2t_b"].reshape(1, L).astype(jnp.float32)            # (1, L)

    TB = T * Bs
    out = pl.pallas_call(
        functools.partial(_bilstm_tag_kernel, T=T, Bs=Bs, H=H),
        grid=(NS,),
        in_specs=[
            pl.BlockSpec((None, TB, K2), lambda i: (i, 0, 0)),
            pl.BlockSpec((K2, G), lambda i: (0, 0)),
            pl.BlockSpec((2 * H, G), lambda i: (0, 0)),
            pl.BlockSpec((2 * H, L), lambda i: (0, 0)),
            pl.BlockSpec((1, L), lambda i: (0, 0)),
        ],
        out_specs=pl.BlockSpec((None, TB, 128), lambda i: (i, 0, 0)),
        out_shape=jax.ShapeDtypeStruct((NS, TB, 128), jnp.int32),
        scratch_shapes=[
            pltpu.VMEM((TB, G), jnp.float32),   # blended pre-gates
            pltpu.VMEM((TB, H), jnp.float32),   # forward hidden sequence
            pltpu.VMEM((TB, H), jnp.float32),   # backward hidden sequence
        ],
        compiler_params=pltpu.CompilerParams(
            dimension_semantics=("parallel",)),
    )(x2, wih2, whh, w2t, b2t)

    # lane 0 holds the tag; back to (B, T); decode = mask * tags (lane-dense kernel
    # output, mask multiply is a free elementwise op in the wrapper)
    tags_tm = out[:, :, 0].reshape(NS, T, Bs)
    tags = jnp.transpose(tags_tm, (0, 2, 1)).reshape(Bpad, T)[:B]
    return mask.astype(jnp.int32) * tags


# ----------------------------------------------------------------------------
# Pure-JAX reference (for a semantic self-check)
# ----------------------------------------------------------------------------
def reference_forward(params, word_inputs, biword_inputs, mask):
    hi = jax.lax.Precision.HIGHEST
    we = jnp.take(params["word_emb"], word_inputs, axis=0)
    be = jnp.take(params["biword_emb"], biword_inputs, axis=0)
    x = jnp.concatenate([we, be], axis=2).astype(jnp.float32)     # (B,T,D)
    x_tm = jnp.transpose(x, (1, 0, 2))                            # (T,B,D)

    def run(xs, w_ih, w_hh, b):
        Hh = w_hh.shape[0]

        def step(carry, x_t):
            h, c = carry
            g = (jnp.dot(x_t, w_ih, precision=hi)
                 + jnp.dot(h, w_hh, precision=hi) + b)
            i = jax.nn.sigmoid(g[:, 0:Hh])
            f = jax.nn.sigmoid(g[:, Hh:2 * Hh])
            gg = jnp.tanh(g[:, 2 * Hh:3 * Hh])
            o = jax.nn.sigmoid(g[:, 3 * Hh:4 * Hh])
            c = f * c + i * gg
            h = o * jnp.tanh(c)
            return (h, c), h

        Bsz = xs.shape[1]
        init = (jnp.zeros((Bsz, Hh), jnp.float32),
                jnp.zeros((Bsz, Hh), jnp.float32))
        _, hs = jax.lax.scan(step, init, xs)
        return hs                                                  # (T,B,H)

    h_f = run(x_tm, params["fwd_w_ih"], params["fwd_w_hh"], params["fwd_b"])
    h_b = run(x_tm[::-1], params["bwd_w_ih"], params["bwd_w_hh"],
              params["bwd_b"])[::-1]
    feats = jnp.transpose(jnp.concatenate([h_f, h_b], axis=2), (1, 0, 2))  # (B,T,2H)
    logits = jnp.dot(feats, params["h2t_w"], precision=hi) + params["h2t_b"]
    tags = jnp.argmax(logits, axis=-1).astype(jnp.int32)
    return mask.astype(jnp.int32) * tags, logits


# ----------------------------------------------------------------------------
# Deterministic parameter init (mirrors module __init__ shapes)
# ----------------------------------------------------------------------------
def init_params(key, *, word_vocab, biword_vocab, word_emb_dim,
                biword_emb_dim, hidden_dim, num_labels):
    lstm_hidden = hidden_dim // 2               # bilstm_flag=True
    lstm_input = word_emb_dim + biword_emb_dim  # use_bigram=True, use_char=False

    keys = jax.random.split(key, 10)

    def unif(k, shape, scale):
        return jax.random.uniform(k, shape, jnp.float32, -scale, scale)

    emb_scale_w = (3.0 / word_emb_dim) ** 0.5
    emb_scale_b = (3.0 / biword_emb_dim) ** 0.5
    lstm_scale = 1.0 / (lstm_hidden ** 0.5)
    lin_scale = 1.0 / (hidden_dim ** 0.5)

    return {
        "word_emb": unif(keys[0], (word_vocab, word_emb_dim), emb_scale_w),
        "biword_emb": unif(keys[1], (biword_vocab, biword_emb_dim), emb_scale_b),
        # forward LatticeLSTM (character path -> plain LSTM weights), gate order i,f,g,o
        "fwd_w_ih": unif(keys[2], (lstm_input, 4 * lstm_hidden), lstm_scale),
        "fwd_w_hh": unif(keys[3], (lstm_hidden, 4 * lstm_hidden), lstm_scale),
        "fwd_b": unif(keys[4], (4 * lstm_hidden,), lstm_scale),
        # backward LatticeLSTM
        "bwd_w_ih": unif(keys[5], (lstm_input, 4 * lstm_hidden), lstm_scale),
        "bwd_w_hh": unif(keys[6], (lstm_hidden, 4 * lstm_hidden), lstm_scale),
        "bwd_b": unif(keys[7], (4 * lstm_hidden,), lstm_scale),
        # hidden2tag
        "h2t_w": unif(keys[8], (hidden_dim, num_labels), lin_scale),
        "h2t_b": unif(keys[9], (num_labels,), lin_scale),
    }


# ----------------------------------------------------------------------------
if __name__ == "__main__":
    key = jax.random.PRNGKey(0)

    # small, module-consistent config
    BATCH, SEQ = 2, 8
    WORD_VOCAB, BIWORD_VOCAB = 50, 60
    WORD_EMB, BIWORD_EMB = 32, 16
    HIDDEN_DIM = 32            # lstm_hidden = 16 per direction
    NUM_LABELS = 8

    pkey, k_w, k_bw = jax.random.split(key, 3)
    params = init_params(
        pkey,
        word_vocab=WORD_VOCAB, biword_vocab=BIWORD_VOCAB,
        word_emb_dim=WORD_EMB, biword_emb_dim=BIWORD_EMB,
        hidden_dim=HIDDEN_DIM, num_labels=NUM_LABELS,
    )

    word_inputs = jax.random.randint(k_w, (BATCH, SEQ), 1, WORD_VOCAB,
                                     dtype=jnp.int32)
    biword_inputs = jax.random.randint(k_bw, (BATCH, SEQ), 1, BIWORD_VOCAB,
                                       dtype=jnp.int32)
    # last two positions of sample 1 are padding
    # TODO(synk): like the pure-JAX reference, pads still enter the backward
    #             recurrence (differs from pack_padded_sequence semantics).
    mask = jnp.ones((BATCH, SEQ), dtype=jnp.int32)
    mask = mask.at[1, SEQ - 2:].set(0)

    decode_seq = bilstm_forward(params, word_inputs, biword_inputs, mask)
    jax.block_until_ready(decode_seq)

    assert decode_seq.shape == (BATCH, SEQ)
    assert decode_seq.dtype == jnp.int32

    # semantic self-check vs. a pure-JAX reference; tolerate argmax flips only
    # where the reference's own top-2 logit margin is tiny (f32 MXU rounding).
    ref_decode, ref_logits = reference_forward(params, word_inputs,
                                               biword_inputs, mask)
    top2 = jnp.sort(ref_logits, axis=-1)
    margin = top2[..., -1] - top2[..., -2]
    ok = (decode_seq == ref_decode) | (margin < 5e-2) | (mask == 0)
    assert bool(jnp.all(ok)), "kernel decode mismatch vs pure-JAX reference"

    print("KERNEL_OK")
</pallas_src>

<mosaic_0001>
module attributes {stable_mosaic.version = 11 : i64} {
  func.func @_bilstm_tag_kernel(%arg0: i32, %arg1: memref<1x64x104xf32, #tpu.memory_space<vmem>>, %arg2: memref<104x128xf32, #tpu.memory_space<vmem>>, %arg3: memref<32x128xf32, #tpu.memory_space<vmem>>, %arg4: memref<32x8xf32, #tpu.memory_space<vmem>>, %arg5: memref<1x8xf32, #tpu.memory_space<vmem>>, %arg6: memref<1x64x128xi32, #tpu.memory_space<vmem>>, %arg7: memref<64x128xf32, #tpu.memory_space<vmem>>, %arg8: memref<64x16xf32, #tpu.memory_space<vmem>>, %arg9: memref<64x16xf32, #tpu.memory_space<vmem>>) attributes {dimension_semantics = [#tpu.dimension_semantics<parallel>], iteration_bounds = array<i64: 1>, scalar_prefetch = 0 : i64, scratch_operands = 3 : i64, tpu.core_type = #tpu.core_type<tc>, window_params = [{transform_indices = @transform_0, window_bounds = array<i64: 1, 64, 104>}, {pipeline_mode = #tpu.pipeline_mode<synchronous>, transform_indices = @transform_1, window_bounds = array<i64: 104, 128>}, {pipeline_mode = #tpu.pipeline_mode<synchronous>, transform_indices = @transform_2, window_bounds = array<i64: 32, 128>}, {pipeline_mode = #tpu.pipeline_mode<synchronous>, transform_indices = @transform_3, window_bounds = array<i64: 32, 8>}, {pipeline_mode = #tpu.pipeline_mode<synchronous>, transform_indices = @transform_4, window_bounds = array<i64: 1, 8>}, {transform_indices = @transform_5, window_bounds = array<i64: 1, 64, 128>}]} {
    %c0 = arith.constant 0 : index
    %c0_0 = arith.constant 0 : index
    %c0_1 = arith.constant 0 : index
    %0 = vector.load %arg1[%c0, %c0_0, %c0_1] : memref<1x64x104xf32, #tpu.memory_space<vmem>>, vector<1x64x104xf32>
    %1 = vector.shape_cast %0 : vector<1x64x104xf32> to vector<64x104xf32>
    %c0_2 = arith.constant 0 : index
    %c0_3 = arith.constant 0 : index
    %2 = vector.load %arg2[%c0_2, %c0_3] : memref<104x128xf32, #tpu.memory_space<vmem>>, vector<104x128xf32>
    %cst = arith.constant dense<0.000000e+00> : vector<64x128xf32>
    %3 = tpu.matmul %1, %2, %cst {dimension_numbers = #tpu.dot_dimension_numbers<[1], [0], [0], [1], [0, 0, 1, 1], [], []>} : vector<64x104xf32>, vector<104x128xf32>, vector<64x128xf32> -> vector<64x128xf32>
    %c0_4 = arith.constant 0 : index
    %c0_5 = arith.constant 0 : index
    %4 = vector.load %arg7[%c0_4, %c0_5] : memref<64x128xf32, #tpu.memory_space<vmem>>, vector<64x128xf32>
    tpu.vector_store %arg7[%c0_4, %c0_5], %3 {strides = array<i32>} : memref<64x128xf32, #tpu.memory_space<vmem>>, vector<64x128xf32>,
    %c0_6 = arith.constant 0 : index
    %c0_7 = arith.constant 0 : index
    %5 = vector.load %arg3[%c0_6, %c0_7] : memref<32x128xf32, #tpu.memory_space<vmem>>, vector<32x128xf32>
    %cst_8 = arith.constant 0.000000e+00 : f32
    %6 = vector.broadcast %cst_8 : f32 to vector<8x32xf32>
    %cst_9 = arith.constant 0.000000e+00 : f32
    %7 = vector.broadcast %cst_9 : f32 to vector<8x32xf32>
    %c0_10 = arith.constant 0 : index
    %c0_11 = arith.constant 0 : index
    %8 = vector.load %arg7[%c0_10, %c0_11] : memref<64x128xf32, #tpu.memory_space<vmem>>, vector<8x128xf32>
    %cst_12 = arith.constant dense<0.000000e+00> : vector<8x128xf32>
    %9 = tpu.matmul %6, %5, %cst_12 {dimension_numbers = #tpu.dot_dimension_numbers<[1], [0], [0], [1], [0, 0, 1, 1], [], []>} : vector<8x32xf32>, vector<32x128xf32>, vector<8x128xf32> -> vector<8x128xf32>
    %10 = arith.addf %8, %9 : vector<8x128xf32>
    %11 = vector.extract_strided_slice %10 {offsets = [0, 0], sizes = [8, 96], strides = [1, 1]} : vector<8x128xf32> to vector<8x96xf32>
    %12 = arith.negf %11 : vector<8x96xf32>
    %13 = math.exp %12 : vector<8x96xf32>
    %cst_13 = arith.constant 1.000000e+00 : f32
    %14 = vector.broadcast %cst_13 : f32 to vector<8x96xf32>
    %15 = arith.addf %14, %13 : vector<8x96xf32>
    %16 = arith.divf %14, %15 : vector<8x96xf32>
    %17 = vector.extract_strided_slice %16 {offsets = [0, 0], sizes = [8, 32], strides = [1, 1]} : vector<8x96xf32> to vector<8x32xf32>
    %18 = vector.extract_strided_slice %16 {offsets = [0, 32], sizes = [8, 32], strides = [1, 1]} : vector<8x96xf32> to vector<8x32xf32>
    %19 = vector.extract_strided_slice %16 {offsets = [0, 64], sizes = [8, 32], strides = [1, 1]} : vector<8x96xf32> to vector<8x32xf32>
    %20 = vector.extract_strided_slice %10 {offsets = [0, 96], sizes = [8, 32], strides = [1, 1]} : vector<8x128xf32> to vector<8x32xf32>
    %21 = math.tanh %20 : vector<8x32xf32>
    %22 = arith.mulf %18, %7 : vector<8x32xf32>
    %23 = arith.mulf %17, %21 : vector<8x32xf32>
    %24 = arith.addf %22, %23 : vector<8x32xf32>
    %25 = math.tanh %24 : vector<8x32xf32>
    %26 = arith.mulf %19, %25 : vector<8x32xf32>
    %27 = vector.extract_strided_slice %26 {offsets = [0, 0], sizes = [8, 16], strides = [1, 1]} : vector<8x32xf32> to vector<8x16xf32>
    %c0_14 = arith.constant 0 : index
    %c0_15 = arith.constant 0 : index
    %28 = vector.load %arg8[%c0_14, %c0_15] : memref<64x16xf32, #tpu.memory_space<vmem>>, vector<8x16xf32>
    tpu.vector_store %arg8[%c0_14, %c0_15], %27 {strides = array<i32>} : memref<64x16xf32, #tpu.memory_space<vmem>>, vector<8x16xf32>,
    %29 = vector.extract_strided_slice %26 {offsets = [0, 16], sizes = [8, 16], strides = [1, 1]} : vector<8x32xf32> to vector<8x16xf32>
    %c56 = arith.constant 56 : index
    %c0_16 = arith.constant 0 : index
    %30 = vector.load %arg9[%c56, %c0_16] : memref<64x16xf32, #tpu.memory_space<vmem>>, vector<8x16xf32>
    tpu.vector_store %arg9[%c56, %c0_16], %29 {strides = array<i32>} : memref<64x16xf32, #tpu.memory_space<vmem>>, vector<8x16xf32>,
    %c8 = arith.constant 8 : index
    %c0_17 = arith.constant 0 : index
    %31 = vector.load %arg7[%c8, %c0_17] : memref<64x128xf32, #tpu.memory_space<vmem>>, vector<8x128xf32>
    %cst_18 = arith.constant dense<0.000000e+00> : vector<8x128xf32>
    %32 = tpu.matmul %26, %5, %cst_18 {dimension_numbers = #tpu.dot_dimension_numbers<[1], [0], [0], [1], [0, 0, 1, 1], [], []>} : vector<8x32xf32>, vector<32x128xf32>, vector<8x128xf32> -> vector<8x128xf32>
    %33 = arith.addf %31, %32 : vector<8x128xf32>
    %34 = vector.extract_strided_slice %33 {offsets = [0, 0], sizes = [8, 96], strides = [1, 1]} : vector<8x128xf32> to vector<8x96xf32>
    %35 = arith.negf %34 : vector<8x96xf32>
    %36 = math.exp %35 : vector<8x96xf32>
    %cst_19 = arith.constant 1.000000e+00 : f32
    %37 = vector.broadcast %cst_19 : f32 to vector<8x96xf32>
    %38 = arith.addf %37, %36 : vector<8x96xf32>
    %39 = arith.divf %37, %38 : vector<8x96xf32>
    %40 = vector.extract_strided_slice %39 {offsets = [0, 0], sizes = [8, 32], strides = [1, 1]} : vector<8x96xf32> to vector<8x32xf32>
    %41 = vector.extract_strided_slice %39 {offsets = [0, 32], sizes = [8, 32], strides = [1, 1]} : vector<8x96xf32> to vector<8x32xf32>
    %42 = vector.extract_strided_slice %39 {offsets = [0, 64], sizes = [8, 32], strides = [1, 1]} : vector<8x96xf32> to vector<8x32xf32>
    %43 = vector.extract_strided_slice %33 {offsets = [0, 96], sizes = [8, 32], strides = [1, 1]} : vector<8x128xf32> to vector<8x32xf32>
    %44 = math.tanh %43 : vector<8x32xf32>
    %45 = arith.mulf %41, %24 : vector<8x32xf32>
    %46 = arith.mulf %40, %44 : vector<8x32xf32>
    %47 = arith.addf %45, %46 : vector<8x32xf32>
    %48 = math.tanh %47 : vector<8x32xf32>
    %49 = arith.mulf %42, %48 : vector<8x32xf32>
    %50 = vector.extract_strided_slice %49 {offsets = [0, 0], sizes = [8, 16], strides = [1, 1]} : vector<8x32xf32> to vector<8x16xf32>
    %c8_20 = arith.constant 8 : index
    %c0_21 = arith.constant 0 : index
    %51 = vector.load %arg8[%c8_20, %c0_21] : memref<64x16xf32, #tpu.memory_space<vmem>>, vector<8x16xf32>
    tpu.vector_store %arg8[%c8_20, %c0_21], %50 {strides = array<i32>} : memref<64x16xf32, #tpu.memory_space<vmem>>, vector<8x16xf32>,
    %52 = vector.extract_strided_slice %49 {offsets = [0, 16], sizes = [8, 16], strides = [1, 1]} : vector<8x32xf32> to vector<8x16xf32>
    %c48 = arith.constant 48 : index
    %c0_22 = arith.constant 0 : index
    %53 = vector.load %arg9[%c48, %c0_22] : memref<64x16xf32, #tpu.memory_space<vmem>>, vector<8x16xf32>
    tpu.vector_store %arg9[%c48, %c0_22], %52 {strides = array<i32>} : memref<64x16xf32, #tpu.memory_space<vmem>>, vector<8x16xf32>,
    %c16 = arith.constant 16 : index
    %c0_23 = arith.constant 0 : index
    %54 = vector.load %arg7[%c16, %c0_23] : memref<64x128xf32, #tpu.memory_space<vmem>>, vector<8x128xf32>
    %cst_24 = arith.constant dense<0.000000e+00> : vector<8x128xf32>
    %55 = tpu.matmul %49, %5, %cst_24 {dimension_numbers = #tpu.dot_dimension_numbers<[1], [0], [0], [1], [0, 0, 1, 1], [], []>} : vector<8x32xf32>, vector<32x128xf32>, vector<8x128xf32> -> vector<8x128xf32>
    %56 = arith.addf %54, %55 : vector<8x128xf32>
    %57 = vector.extract_strided_slice %56 {offsets = [0, 0], sizes = [8, 96], strides = [1, 1]} : vector<8x128xf32> to vector<8x96xf32>
    %58 = arith.negf %57 : vector<8x96xf32>
    %59 = math.exp %58 : vector<8x96xf32>
    %cst_25 = arith.constant 1.000000e+00 : f32
    %60 = vector.broadcast %cst_25 : f32 to vector<8x96xf32>
    %61 = arith.addf %60, %59 : vector<8x96xf32>
    %62 = arith.divf %60, %61 : vector<8x96xf32>
    %63 = vector.extract_strided_slice %62 {offsets = [0, 0], sizes = [8, 32], strides = [1, 1]} : vector<8x96xf32> to vector<8x32xf32>
    %64 = vector.extract_strided_slice %62 {offsets = [0, 32], sizes = [8, 32], strides = [1, 1]} : vector<8x96xf32> to vector<8x32xf32>
    %65 = vector.extract_strided_slice %62 {offsets = [0, 64], sizes = [8, 32], strides = [1, 1]} : vector<8x96xf32> to vector<8x32xf32>
    %66 = vector.extract_strided_slice %56 {offsets = [0, 96], sizes = [8, 32], strides = [1, 1]} : vector<8x128xf32> to vector<8x32xf32>
    %67 = math.tanh %66 : vector<8x32xf32>
    %68 = arith.mulf %64, %47 : vector<8x32xf32>
    %69 = arith.mulf %63, %67 : vector<8x32xf32>
    %70 = arith.addf %68, %69 : vector<8x32xf32>
    %71 = math.tanh %70 : vector<8x32xf32>
    %72 = arith.mulf %65, %71 : vector<8x32xf32>
    %73 = vector.extract_strided_slice %72 {offsets = [0, 0], sizes = [8, 16], strides = [1, 1]} : vector<8x32xf32> to vector<8x16xf32>
    %c16_26 = arith.constant 16 : index
    %c0_27 = arith.constant 0 : index
    %74 = vector.load %arg8[%c16_26, %c0_27] : memref<64x16xf32, #tpu.memory_space<vmem>>, vector<8x16xf32>
    tpu.vector_store %arg8[%c16_26, %c0_27], %73 {strides = array<i32>} : memref<64x16xf32, #tpu.memory_space<vmem>>, vector<8x16xf32>,
    %75 = vector.extract_strided_slice %72 {offsets = [0, 16], sizes = [8, 16], strides = [1, 1]} : vector<8x32xf32> to vector<8x16xf32>
    %c40 = arith.constant 40 : index
    %c0_28 = arith.constant 0 : index
    %76 = vector.load %arg9[%c40, %c0_28] : memref<64x16xf32, #tpu.memory_space<vmem>>, vector<8x16xf32>
    tpu.vector_store %arg9[%c40, %c0_28], %75 {strides = array<i32>} : memref<64x16xf32, #tpu.memory_space<vmem>>, vector<8x16xf32>,
    %c24 = arith.constant 24 : index
    %c0_29 = arith.constant 0 : index
    %77 = vector.load %arg7[%c24, %c0_29] : memref<64x128xf32, #tpu.memory_space<vmem>>, vector<8x128xf32>
    %cst_30 = arith.constant dense<0.000000e+00> : vector<8x128xf32>
    %78 = tpu.matmul %72, %5, %cst_30 {dimension_numbers = #tpu.dot_dimension_numbers<[1], [0], [0], [1], [0, 0, 1, 1], [], []>} : vector<8x32xf32>, vector<32x128xf32>, vector<8x128xf32> -> vector<8x128xf32>
    %79 = arith.addf %77, %78 : vector<8x128xf32>
    %80 = vector.extract_strided_slice %79 {offsets = [0, 0], sizes = [8, 96], strides = [1, 1]} : vector<8x128xf32> to vector<8x96xf32>
    %81 = arith.negf %80 : vector<8x96xf32>
    %82 = math.exp %81 : vector<8x96xf32>
    %cst_31 = arith.constant 1.000000e+00 : f32
    %83 = vector.broadcast %cst_31 : f32 to vector<8x96xf32>
    %84 = arith.addf %83, %82 : vector<8x96xf32>
    %85 = arith.divf %83, %84 : vector<8x96xf32>
    %86 = vector.extract_strided_slice %85 {offsets = [0, 0], sizes = [8, 32], strides = [1, 1]} : vector<8x96xf32> to vector<8x32xf32>
    %87 = vector.extract_strided_slice %85 {offsets = [0, 32], sizes = [8, 32], strides = [1, 1]} : vector<8x96xf32> to vector<8x32xf32>
    %88 = vector.extract_strided_slice %85 {offsets = [0, 64], sizes = [8, 32], strides = [1, 1]} : vector<8x96xf32> to vector<8x32xf32>
    %89 = vector.extract_strided_slice %79 {offsets = [0, 96], sizes = [8, 32], strides = [1, 1]} : vector<8x128xf32> to vector<8x32xf32>
    %90 = math.tanh %89 : vector<8x32xf32>
    %91 = arith.mulf %87, %70 : vector<8x32xf32>
    %92 = arith.mulf %86, %90 : vector<8x32xf32>
    %93 = arith.addf %91, %92 : vector<8x32xf32>
    %94 = math.tanh %93 : vector<8x32xf32>
    %95 = arith.mulf %88, %94 : vector<8x32xf32>
    %96 = vector.extract_strided_slice %95 {offsets = [0, 0], sizes = [8, 16], strides = [1, 1]} : vector<8x32xf32> to vector<8x16xf32>
    %c24_32 = arith.constant 24 : index
    %c0_33 = arith.constant 0 : index
    %97 = vector.load %arg8[%c24_32, %c0_33] : memref<64x16xf32, #tpu.memory_space<vmem>>, vector<8x16xf32>
    tpu.vector_store %arg8[%c24_32, %c0_33], %96 {strides = array<i32>} : memref<64x16xf32, #tpu.memory_space<vmem>>, vector<8x16xf32>,
    %98 = vector.extract_strided_slice %95 {offsets = [0, 16], sizes = [8, 16], strides = [1, 1]} : vector<8x32xf32> to vector<8x16xf32>
    %c32 = arith.constant 32 : index
    %c0_34 = arith.constant 0 : index
    %99 = vector.load %arg9[%c32, %c0_34] : memref<64x16xf32, #tpu.memory_space<vmem>>, vector<8x16xf32>
    tpu.vector_store %arg9[%c32, %c0_34], %98 {strides = array<i32>} : memref<64x16xf32, #tpu.memory_space<vmem>>, vector<8x16xf32>,
    %c32_35 = arith.constant 32 : index
    %c0_36 = arith.constant 0 : index
    %100 = vector.load %arg7[%c32_35, %c0_36] : memref<64x128xf32, #tpu.memory_space<vmem>>, vector<8x128xf32>
    %cst_37 = arith.constant dense<0.000000e+00> : vector<8x128xf32>
    %101 = tpu.matmul %95, %5, %cst_37 {dimension_numbers = #tpu.dot_dimension_numbers<[1], [0], [0], [1], [0, 0, 1, 1], [], []>} : vector<8x32xf32>, vector<32x128xf32>, vector<8x128xf32> -> vector<8x128xf32>
    %102 = arith.addf %100, %101 : vector<8x128xf32>
    %103 = vector.extract_strided_slice %102 {offsets = [0, 0], sizes = [8, 96], strides = [1, 1]} : vector<8x128xf32> to vector<8x96xf32>
    %104 = arith.negf %103 : vector<8x96xf32>
    %105 = math.exp %104 : vector<8x96xf32>
    %cst_38 = arith.constant 1.000000e+00 : f32
    %106 = vector.broadcast %cst_38 : f32 to vector<8x96xf32>
    %107 = arith.addf %106, %105 : vector<8x96xf32>
    %108 = arith.divf %106, %107 : vector<8x96xf32>
    %109 = vector.extract_strided_slice %108 {offsets = [0, 0], sizes = [8, 32], strides = [1, 1]} : vector<8x96xf32> to vector<8x32xf32>
    %110 = vector.extract_strided_slice %108 {offsets = [0, 32], sizes = [8, 32], strides = [1, 1]} : vector<8x96xf32> to vector<8x32xf32>
    %111 = vector.extract_strided_slice %108 {offsets = [0, 64], sizes = [8, 32], strides = [1, 1]} : vector<8x96xf32> to vector<8x32xf32>
    %112 = vector.extract_strided_slice %102 {offsets = [0, 96], sizes = [8, 32], strides = [1, 1]} : vector<8x128xf32> to vector<8x32xf32>
    %113 = math.tanh %112 : vector<8x32xf32>
    %114 = arith.mulf %110, %93 : vector<8x32xf32>
    %115 = arith.mulf %109, %113 : vector<8x32xf32>
    %116 = arith.addf %114, %115 : vector<8x32xf32>
    %117 = math.tanh %116 : vector<8x32xf32>
    %118 = arith.mulf %111, %117 : vector<8x32xf32>
    %119 = vector.extract_strided_slice %118 {offsets = [0, 0], sizes = [8, 16], strides = [1, 1]} : vector<8x32xf32> to vector<8x16xf32>
    %c32_39 = arith.constant 32 : index
    %c0_40 = arith.constant 0 : index
    %120 = vector.load %arg8[%c32_39, %c0_40] : memref<64x16xf32, #tpu.memory_space<vmem>>, vector<8x16xf32>
    tpu.vector_store %arg8[%c32_39, %c0_40], %119 {strides = array<i32>} : memref<64x16xf32, #tpu.memory_space<vmem>>, vector<8x16xf32>,
    %121 = vector.extract_strided_slice %118 {offsets = [0, 16], sizes = [8, 16], strides = [1, 1]} : vector<8x32xf32> to vector<8x16xf32>
    %c24_41 = arith.constant 24 : index
    %c0_42 = arith.constant 0 : index
    %122 = vector.load %arg9[%c24_41, %c0_42] : memref<64x16xf32, #tpu.memory_space<vmem>>, vector<8x16xf32>
    tpu.vector_store %arg9[%c24_41, %c0_42], %121 {strides = array<i32>} : memref<64x16xf32, #tpu.memory_space<vmem>>, vector<8x16xf32>,
    %c40_43 = arith.constant 40 : index
    %c0_44 = arith.constant 0 : index
    %123 = vector.load %arg7[%c40_43, %c0_44] : memref<64x128xf32, #tpu.memory_space<vmem>>, vector<8x128xf32>
    %cst_45 = arith.constant dense<0.000000e+00> : vector<8x128xf32>
    %124 = tpu.matmul %118, %5, %cst_45 {dimension_numbers = #tpu.dot_dimension_numbers<[1], [0], [0], [1], [0, 0, 1, 1], [], []>} : vector<8x32xf32>, vector<32x128xf32>, vector<8x128xf32> -> vector<8x128xf32>
    %125 = arith.addf %123, %124 : vector<8x128xf32>
    %126 = vector.extract_strided_slice %125 {offsets = [0, 0], sizes = [8, 96], strides = [1, 1]} : vector<8x128xf32> to vector<8x96xf32>
    %127 = arith.negf %126 : vector<8x96xf32>
    %128 = math.exp %127 : vector<8x96xf32>
    %cst_46 = arith.constant 1.000000e+00 : f32
    %129 = vector.broadcast %cst_46 : f32 to vector<8x96xf32>
    %130 = arith.addf %129, %128 : vector<8x96xf32>
    %131 = arith.divf %129, %130 : vector<8x96xf32>
    %132 = vector.extract_strided_slice %131 {offsets = [0, 0], sizes = [8, 32], strides = [1, 1]} : vector<8x96xf32> to vector<8x32xf32>
    %133 = vector.extract_strided_slice %131 {offsets = [0, 32], sizes = [8, 32], strides = [1, 1]} : vector<8x96xf32> to vector<8x32xf32>
    %134 = vector.extract_strided_slice %131 {offsets = [0, 64], sizes = [8, 32], strides = [1, 1]} : vector<8x96xf32> to vector<8x32xf32>
    %135 = vector.extract_strided_slice %125 {offsets = [0, 96], sizes = [8, 32], strides = [1, 1]} : vector<8x128xf32> to vector<8x32xf32>
    %136 = math.tanh %135 : vector<8x32xf32>
    %137 = arith.mulf %133, %116 : vector<8x32xf32>
    %138 = arith.mulf %132, %136 : vector<8x32xf32>
    %139 = arith.addf %137, %138 : vector<8x32xf32>
    %140 = math.tanh %139 : vector<8x32xf32>
    %141 = arith.mulf %134, %140 : vector<8x32xf32>
    %142 = vector.extract_strided_slice %141 {offsets = [0, 0], sizes = [8, 16], strides = [1, 1]} : vector<8x32xf32> to vector<8x16xf32>
    %c40_47 = arith.constant 40 : index
    %c0_48 = arith.constant 0 : index
    %143 = vector.load %arg8[%c40_47, %c0_48] : memref<64x16xf32, #tpu.memory_space<vmem>>, vector<8x16xf32>
    tpu.vector_store %arg8[%c40_47, %c0_48], %142 {strides = array<i32>} : memref<64x16xf32, #tpu.memory_space<vmem>>, vector<8x16xf32>,
    %144 = vector.extract_strided_slice %141 {offsets = [0, 16], sizes = [8, 16], strides = [1, 1]} : vector<8x32xf32> to vector<8x16xf32>
    %c16_49 = arith.constant 16 : index
    %c0_50 = arith.constant 0 : index
    %145 = vector.load %arg9[%c16_49, %c0_50] : memref<64x16xf32, #tpu.memory_space<vmem>>, vector<8x16xf32>
    tpu.vector_store %arg9[%c16_49, %c0_50], %144 {strides = array<i32>} : memref<64x16xf32, #tpu.memory_space<vmem>>, vector<8x16xf32>,
    %c48_51 = arith.constant 48 : index
    %c0_52 = arith.constant 0 : index
    %146 = vector.load %arg7[%c48_51, %c0_52] : memref<64x128xf32, #tpu.memory_space<vmem>>, vector<8x128xf32>
    %cst_53 = arith.constant dense<0.000000e+00> : vector<8x128xf32>
    %147 = tpu.matmul %141, %5, %cst_53 {dimension_numbers = #tpu.dot_dimension_numbers<[1], [0], [0], [1], [0, 0, 1, 1], [], []>} : vector<8x32xf32>, vector<32x128xf32>, vector<8x128xf32> -> vector<8x128xf32>
    %148 = arith.addf %146, %147 : vector<8x128xf32>
    %149 = vector.extract_strided_slice %148 {offsets = [0, 0], sizes = [8, 96], strides = [1, 1]} : vector<8x128xf32> to vector<8x96xf32>
    %150 = arith.negf %149 : vector<8x96xf32>
    %151 = math.exp %150 : vector<8x96xf32>
    %cst_54 = arith.constant 1.000000e+00 : f32
    %152 = vector.broadcast %cst_54 : f32 to vector<8x96xf32>
    %153 = arith.addf %152, %151 : vector<8x96xf32>
    %154 = arith.divf %152, %153 : vector<8x96xf32>
    %155 = vector.extract_strided_slice %154 {offsets = [0, 0], sizes = [8, 32], strides = [1, 1]} : vector<8x96xf32> to vector<8x32xf32>
    %156 = vector.extract_strided_slice %154 {offsets = [0, 32], sizes = [8, 32], strides = [1, 1]} : vector<8x96xf32> to vector<8x32xf32>
    %157 = vector.extract_strided_slice %154 {offsets = [0, 64], sizes = [8, 32], strides = [1, 1]} : vector<8x96xf32> to vector<8x32xf32>
    %158 = vector.extract_strided_slice %148 {offsets = [0, 96], sizes = [8, 32], strides = [1, 1]} : vector<8x128xf32> to vector<8x32xf32>
    %159 = math.tanh %158 : vector<8x32xf32>
    %160 = arith.mulf %156, %139 : vector<8x32xf32>
    %161 = arith.mulf %155, %159 : vector<8x32xf32>
    %162 = arith.addf %160, %161 : vector<8x32xf32>
    %163 = math.tanh %162 : vector<8x32xf32>
    %164 = arith.mulf %157, %163 : vector<8x32xf32>
    %165 = vector.extract_strided_slice %164 {offsets = [0, 0], sizes = [8, 16], strides = [1, 1]} : vector<8x32xf32> to vector<8x16xf32>
    %c48_55 = arith.constant 48 : index
    %c0_56 = arith.constant 0 : index
    %166 = vector.load %arg8[%c48_55, %c0_56] : memref<64x16xf32, #tpu.memory_space<vmem>>, vector<8x16xf32>
    tpu.vector_store %arg8[%c48_55, %c0_56], %165 {strides = array<i32>} : memref<64x16xf32, #tpu.memory_space<vmem>>, vector<8x16xf32>,
    %167 = vector.extract_strided_slice %164 {offsets = [0, 16], sizes = [8, 16], strides = [1, 1]} : vector<8x32xf32> to vector<8x16xf32>
    %c8_57 = arith.constant 8 : index
    %c0_58 = arith.constant 0 : index
    %168 = vector.load %arg9[%c8_57, %c0_58] : memref<64x16xf32, #tpu.memory_space<vmem>>, vector<8x16xf32>
    tpu.vector_store %arg9[%c8_57, %c0_58], %167 {strides = array<i32>} : memref<64x16xf32, #tpu.memory_space<vmem>>, vector<8x16xf32>,
    %c56_59 = arith.constant 56 : index
    %c0_60 = arith.constant 0 : index
    %169 = vector.load %arg7[%c56_59, %c0_60] : memref<64x128xf32, #tpu.memory_space<vmem>>, vector<8x128xf32>
    %cst_61 = arith.constant dense<0.000000e+00> : vector<8x128xf32>
    %170 = tpu.matmul %164, %5, %cst_61 {dimension_numbers = #tpu.dot_dimension_numbers<[1], [0], [0], [1], [0, 0, 1, 1], [], []>} : vector<8x32xf32>, vector<32x128xf32>, vector<8x128xf32> -> vector<8x128xf32>
    %171 = arith.addf %169, %170 : vector<8x128xf32>
    %172 = vector.extract_strided_slice %171 {offsets = [0, 0], sizes = [8, 96], strides = [1, 1]} : vector<8x128xf32> to vector<8x96xf32>
    %173 = arith.negf %172 : vector<8x96xf32>
    %174 = math.exp %173 : vector<8x96xf32>
    %cst_62 = arith.constant 1.000000e+00 : f32
    %175 = vector.broadcast %cst_62 : f32 to vector<8x96xf32>
    %176 = arith.addf %175, %174 : vector<8x96xf32>
    %177 = arith.divf %175, %176 : vector<8x96xf32>
    %178 = vector.extract_strided_slice %177 {offsets = [0, 0], sizes = [8, 32], strides = [1, 1]} : vector<8x96xf32> to vector<8x32xf32>
    %179 = vector.extract_strided_slice %177 {offsets = [0, 32], sizes = [8, 32], strides = [1, 1]} : vector<8x96xf32> to vector<8x32xf32>
    %180 = vector.extract_strided_slice %177 {offsets = [0, 64], sizes = [8, 32], strides = [1, 1]} : vector<8x96xf32> to vector<8x32xf32>
    %181 = vector.extract_strided_slice %171 {offsets = [0, 96], sizes = [8, 32], strides = [1, 1]} : vector<8x128xf32> to vector<8x32xf32>
    %182 = math.tanh %181 : vector<8x32xf32>
    %183 = arith.mulf %179, %162 : vector<8x32xf32>
    %184 = arith.mulf %178, %182 : vector<8x32xf32>
    %185 = arith.addf %183, %184 : vector<8x32xf32>
    %186 = math.tanh %185 : vector<8x32xf32>
    %187 = arith.mulf %180, %186 : vector<8x32xf32>
    %188 = vector.extract_strided_slice %187 {offsets = [0, 0], sizes = [8, 16], strides = [1, 1]} : vector<8x32xf32> to vector<8x16xf32>
    %c56_63 = arith.constant 56 : index
    %c0_64 = arith.constant 0 : index
    %189 = vector.load %arg8[%c56_63, %c0_64] : memref<64x16xf32, #tpu.memory_space<vmem>>, vector<8x16xf32>
    tpu.vector_store %arg8[%c56_63, %c0_64], %188 {strides = array<i32>} : memref<64x16xf32, #tpu.memory_space<vmem>>, vector<8x16xf32>,
    %190 = vector.extract_strided_slice %187 {offsets = [0, 16], sizes = [8, 16], strides = [1, 1]} : vector<8x32xf32> to vector<8x16xf32>
    %c0_65 = arith.constant 0 : index
    %c0_66 = arith.constant 0 : index
    %191 = vector.load %arg9[%c0_65, %c0_66] : memref<64x16xf32, #tpu.memory_space<vmem>>, vector<8x16xf32>
    tpu.vector_store %arg9[%c0_65, %c0_66], %190 {strides = array<i32>} : memref<64x16xf32, #tpu.memory_space<vmem>>, vector<8x16xf32>,
    %c0_67 = arith.constant 0 : index
    %c0_68 = arith.constant 0 : index
    %192 = vector.load %arg8[%c0_67, %c0_68] : memref<64x16xf32, #tpu.memory_space<vmem>>, vector<64x16xf32>
    %c0_69 = arith.constant 0 : index
    %c0_70 = arith.constant 0 : index
    %193 = vector.load %arg4[%c0_69, %c0_70] : memref<32x8xf32, #tpu.memory_space<vmem>>, vector<16x8xf32>
    %cst_71 = arith.constant dense<0.000000e+00> : vector<64x8xf32>
    %194 = tpu.matmul %192, %193, %cst_71 {dimension_numbers = #tpu.dot_dimension_numbers<[1], [0], [0], [1], [0, 0, 1, 1], [], []>} : vector<64x16xf32>, vector<16x8xf32>, vector<64x8xf32> -> vector<64x8xf32>
    %c0_72 = arith.constant 0 : index
    %c0_73 = arith.constant 0 : index
    %195 = vector.load %arg9[%c0_72, %c0_73] : memref<64x16xf32, #tpu.memory_space<vmem>>, vector<64x16xf32>
    %c16_74 = arith.constant 16 : index
    %c0_75 = arith.constant 0 : index
    %196 = vector.load %arg4[%c16_74, %c0_75] : memref<32x8xf32, #tpu.memory_space<vmem>>, vector<16x8xf32>
    %cst_76 = arith.constant dense<0.000000e+00> : vector<64x8xf32>
    %197 = tpu.matmul %195, %196, %cst_76 {dimension_numbers = #tpu.dot_dimension_numbers<[1], [0], [0], [1], [0, 0, 1, 1], [], []>} : vector<64x16xf32>, vector<16x8xf32>, vector<64x8xf32> -> vector<64x8xf32>
    %198 = arith.addf %194, %197 : vector<64x8xf32>
    %c0_77 = arith.constant 0 : index
    %c0_78 = arith.constant 0 : index
    %199 = vector.load %arg5[%c0_77, %c0_78] : memref<1x8xf32, #tpu.memory_space<vmem>>, vector<1x8xf32>
    %200 = vector.broadcast %199 : vector<1x8xf32> to vector<64x8xf32>
    %201 = arith.addf %198, %200 : vector<64x8xf32>
    %cst_79 = arith.constant dense<0xFF800000> : vector<64xf32>
    %202 = vector.multi_reduction <maximumf>, %201, %cst_79 [1] : vector<64x8xf32> to vector<64xf32>
    %203 = vector.shape_cast %202 : vector<64xf32> to vector<64x1xf32>
    %204 = tpu.iota {dimensions = array<i32: 1>} : vector<64x8xi32>
    %205 = arith.sitofp %204 : vector<64x8xi32> to vector<64x8xf32>
    %206 = vector.broadcast %203 : vector<64x1xf32> to vector<64x8xf32>
    %207 = arith.cmpf oge, %201, %206 : vector<64x8xf32>
    %cst_80 = arith.constant 8.000000e+00 : f32
    %208 = vector.broadcast %cst_80 : f32 to vector<64x8xf32>
    %209 = arith.select %207, %205, %208 : vector<64x8xi1>, vector<64x8xf32>
    %cst_81 = arith.constant dense<0x7F800000> : vector<64xf32>
    %210 = vector.multi_reduction <minimumf>, %209, %cst_81 [1] : vector<64x8xf32> to vector<64xf32>
    %211 = vector.shape_cast %210 : vector<64xf32> to vector<64x1xf32>
    %212 = arith.fptosi %211 : vector<64x1xf32> to vector<64x1xi32>
    %213 = vector.shape_cast %212 : vector<64x1xi32> to vector<64x1xi32>
    %214 = vector.broadcast %213 : vector<64x1xi32> to vector<64x128xi32>
    %c0_82 = arith.constant 0 : index
    %c0_83 = arith.constant 0 : index
    %c0_84 = arith.constant 0 : index
    %215 = vector.load %arg6[%c0_82, %c0_83, %c0_84] : memref<1x64x128xi32, #tpu.memory_space<vmem>>, vector<1x64x128xi32>
    %216 = vector.shape_cast %215 : vector<1x64x128xi32> to vector<64x128xi32>
    %217 = vector.shape_cast %214 : vector<64x128xi32> to vector<1x64x128xi32>
    tpu.vector_store %arg6[%c0_82, %c0_83, %c0_84], %217 {strides = array<i32>} : memref<1x64x128xi32, #tpu.memory_space<vmem>>, vector<1x64x128xi32>,
    return
  }
  func.func @transform_0(%arg0: i32) -> (i32, i32, i32) {
    %c0_i32 = arith.constant 0 : i32
    %c0_i32_0 = arith.constant 0 : i32
    %c0_i32_1 = arith.constant 0 : i32
    return %arg0, %c0_i32, %c0_i32_0 : i32, i32, i32
  }
  func.func @transform_1(%arg0: i32) -> (i32, i32) {
    %c0_i32 = arith.constant 0 : i32
    %c0_i32_0 = arith.constant 0 : i32
    %c0_i32_1 = arith.constant 0 : i32
    return %c0_i32, %c0_i32_0 : i32, i32
  }
  func.func @transform_2(%arg0: i32) -> (i32, i32) {
    %c0_i32 = arith.constant 0 : i32
    %c0_i32_0 = arith.constant 0 : i32
    %c0_i32_1 = arith.constant 0 : i32
    return %c0_i32, %c0_i32_0 : i32, i32
  }
  func.func @transform_3(%arg0: i32) -> (i32, i32) {
    %c0_i32 = arith.constant 0 : i32
    %c0_i32_0 = arith.constant 0 : i32
    %c0_i32_1 = arith.constant 0 : i32
    return %c0_i32, %c0_i32_0 : i32, i32
  }
  func.func @transform_4(%arg0: i32) -> (i32, i32) {
    %c0_i32 = arith.constant 0 : i32
    %c0_i32_0 = arith.constant 0 : i32
    %c0_i32_1 = arith.constant 0 : i32
    return %c0_i32, %c0_i32_0 : i32, i32
  }
  func.func @transform_5(%arg0: i32) -> (i32, i32, i32) {
    %c0_i32 = arith.constant 0 : i32
    %c0_i32_0 = arith.constant 0 : i32
    %c0_i32_1 = arith.constant 0 : i32
    return %arg0, %c0_i32, %c0_i32_0 : i32, i32, i32
  }
}

</mosaic_0001>

<bundles_post_ra>
// kernel: squeeze.1
= control target key start
LH: loop header
LB: loop body
LE: loop exit
PB: predicated region body
PF: predicated region fallthrough
CT: control target
= control target key end

     0   :  { %s66_s8 = smov 104   ;;  %vm7_vm0 = vcmask 64512   ;;  %s67_s11 = smov 112   ;;  %s117_s0 = inlined_call_operand.vmem [shape: s32[64], index: 0, kind: input, shape index: {}]   ;;  %s118_s1 = inlined_call_operand.vmem [shape: s32[1,8,8], index: 1, kind: output, shape index: {}]  }
   0x1   :  { %v4_v0 = vld [vmem:[%s117_s0] sm:$0x1]  ;;  %s65_s0 = smov 120   ;;  %s68_s12 = smov 96  }
   0x2   :  { %5 = vst [vmem:[#allocation0] sm:$0x1] %v4_v0  ;;  %s69_s13 = smov 88   ;;  %s70_s14 = smov 80  }
   0x3   :  { %s71_s15 = smov 72  }
   0x9   :  { %v9_v1 = vld [vmem:[#allocation0] sm:$0x1]  }
   0xa   :  { %v21_v2 = vld [vmem:[#allocation0] sm:$0x1]   ;;  %10 = vrot.lane.b32.xlu0 %v9_v1, %s65_s0 }
   0xb   :  { %22 = vrot.lane.b32.xlu1 %v21_v2, %s66_s8  ;;  %v15_v3 = vld [vmem:[#allocation0] sm:$0x1]  }
   0xc   :  { %v27_v4 = vld [vmem:[#allocation0] sm:$0x1]  }
   0xd   :  { %v6_v5 = vld [vmem:[#allocation0] sm:$0x1]  }
   0xe   :  { %8 = vst.msk [vmem:[%s118_s1] sm:$0x1] %vm7_vm0, %v6_v5   ;;  %16 = vrot.lane.b32.xlu0 %v15_v3, %s67_s11  ;;  %v33_v6 = vld [vmem:[#allocation0] sm:$0x1]  }
   0xf   :  { %28 = vrot.lane.b32.xlu1 %v27_v4, %s68_s12  ;;  %v39_v7 = vld [vmem:[#allocation0] sm:$0x1]  }
  0x10   :  { %v45_v8 = vld [vmem:[#allocation0] sm:$0x1]  }
  0x12   :  { %34 = vrot.lane.b32.xlu0 %v33_v6, %s69_s13 }
  0x13   :  { %40 = vrot.lane.b32.xlu1 %v39_v7, %s70_s14 }
  0x16   :  { %46 = vrot.lane.b32.xlu0 %v45_v8, %s71_s15 }
  0x7c   :  { %v11_v9 = vpop.permute.xlu0 %10  }
  0x7d   :  { %v23_v10 = vpop.permute.xlu1 %22   ;;  %51 = vst.msk [vmem:[%s118_s1 + $0x1] sm:$0x1] %vm7_vm0, %v11_v9  }
  0x7e   :  { %53 = vst.msk [vmem:[%s118_s1 + $0x3] sm:$0x1] %vm7_vm0, %v23_v10  }
  0x80   :  { %v17_v11 = vpop.permute.xlu0 %16  }
  0x81   :  { %v29_v12 = vpop.permute.xlu1 %28   ;;  %52 = vst.msk [vmem:[%s118_s1 + $0x2] sm:$0x1] %vm7_vm0, %v17_v11  }
  0x82   :  { %54 = vst.msk [vmem:[%s118_s1 + $0x4] sm:$0x1] %vm7_vm0, %v29_v12  }
  0x84   :  { %v35_v13 = vpop.permute.xlu0 %34  }
  0x85   :  { %v41_v14 = vpop.permute.xlu1 %40   ;;  %55 = vst.msk [vmem:[%s118_s1 + $0x5] sm:$0x1] %vm7_vm0, %v35_v13  }
  0x86   :  { %56 = vst.msk [vmem:[%s118_s1 + $0x6] sm:$0x1] %vm7_vm0, %v41_v14  }
  0x88   :  { %v47_v15 = vpop.permute.xlu0 %46  }
  0x89   :  { %57 = vst.msk [vmem:[%s118_s1 + $0x7] sm:$0x1] %vm7_vm0, %v47_v15  }

// kernel: bilstm_forward.1
= control target key start
LH: loop header
LB: loop body
LE: loop exit
PB: predicated region body
PF: predicated region fallthrough
CT: control target
= control target key end

     0   :  { %v1876_v3 = vmov 0.0|0.0   ;;  %vm1877_vm0 = vmmov 0   ;;  %v1878_v4 = vmov 0.0   ;;  %vm41_vm1 = vcmask 850944   ;;  %s1880_s30 = smov 64   ;;  %s1881_s20 = smov 48   ;;  %s2219_s1 = inlined_call_operand.vmem [shape: f32[104,128], index: 1, kind: input, shape index: {}]   ;;  %s2220_s2 = inlined_call_operand.vmem [shape: f32[32,128], index: 2, kind: input, shape index: {}]   ;;  %s2221_s0 = inlined_call_operand.vmem [shape: f32[1,64,104], index: 0, kind: input, shape index: {}]   ;;  %s2222_s3 = inlined_call_operand.vmem [shape: f32[32,8], index: 3, kind: input, shape index: {}]   ;;  %s2223_s4 = inlined_call_operand.vmem [shape: f32[1,8], index: 4, kind: input, shape index: {}]   ;;  %s2224_s5 = inlined_call_operand.vmem [shape: s32[1,64,128], index: 5, kind: output, shape index: {}]  }
   0x1   :  { %v28_v0 = vld [vmem:[%s2219_s1] sm:$0xff]  ;;  %v29_v1 = vld [vmem:[%s2219_s1 + $0x8] sm:$0xff]  ;;  %v30_v2 = vld [vmem:[%s2219_s1 + $0x10] sm:$0xff]  ;;  %1726 = vmatprep.subr.bf16.mxu1 %v1876_v3  ;;  %1590 = vmatprep.mubr.msk.f32.mxu1 %vm1877_vm0, %v1878_v4  ;;  %vm287_vm2 = vcmask 130048   ;;  %vm184_vm3 = vcmask 261120   ;;  %vm1335_vm4 = vcmask 64512  }
   0x2   :  { %v1702_v5 = vpack.c.bf16 %v29_v1, %v28_v0  ;;  %v31_v6 = vld [vmem:[%s2219_s1 + $0x18] sm:$0xff]  ;;  %v32_v8 = vld [vmem:[%s2219_s1 + $0x20] sm:$0xff]  ;;  %v33_v9 = vld [vmem:[%s2219_s1 + $0x28] sm:$0xff] }
   0x3   :  { %v1706_v7 = vpack.c.bf16 %v31_v6, %v30_v2  ;;  %v179_v10 = vld [vmem:[%s2220_s2] sm:$0xff]  ;;  %v180_v11 = vld [vmem:[%s2220_s2 + $0x8] sm:$0xff]  ;;  %v181_v13 = vld [vmem:[%s2220_s2 + $0x10] sm:$0xff]  ;;  %v1710_v14 = vpack.c.bf16 %v33_v9, %v32_v8 }
   0x4   :  { %1703 = vmatprep.subr.bf16.mxu0 %v1702_v5  ;;  %v1939_v12 = vpack.c.bf16 %v180_v11, %v179_v10  ;;  %v182_v15 = vld [vmem:[%s2220_s2 + $0x18] sm:$0xff]  ;;  %v20_v16 = vld [vmem:[%s2221_s0] sm:$0xff]  ;;  %v34_v17 = vld [vmem:[%s2219_s1 + $0x30] sm:$0xff] }
   0x5   :  { %1705 = vmatpush3.bf16.msra.mxu0 %v1702_v5  ;;  %v35_v18 = vld [vmem:[%s2219_s1 + $0x38] sm:$0xff]  ;;  %v1957_v19 = vpack.c.bf16 %v182_v15, %v181_v13  ;;  %1570 = vmatprep.mubr.msk.f32.mxu0 %vm41_vm1, %v20_v16  ;;  %v36_v21 = vld [vmem:[%s2219_s1 + $0x40] sm:$0xff]  ;;  %v37_v22 = vld [vmem:[%s2219_s1 + $0x48] sm:$0xff] }
   0x6   :  { %1707 = vmatprep.subr.bf16.mxu0 %v1706_v7  ;;  %1728 = vmatpush3.bf16.msra.mxu1 %v1939_v12  ;;  %v1714_v20 = vpack.c.bf16 %v35_v18, %v34_v17  ;;  %v1718_v23 = vpack.c.bf16 %v37_v22, %v36_v21  ;;  %v38_v24 = vld [vmem:[%s2219_s1 + $0x50] sm:$0xff]  ;;  %v39_v25 = vld [vmem:[%s2219_s1 + $0x58] sm:$0xff]  ;;  %v40_v27 = vld [vmem:[%s2219_s1 + $0x60] sm:$0xff]  ;;  %s1879_s1 = smov 32  }
   0x7   :  { %1729 = vmatprep.subr.bf16.mxu1 %v1876_v3  ;;  %v1722_v26 = vpack.c.bf16 %v39_v25, %v38_v24  ;;  %v21_v28 = vld [vmem:[%s2221_s0 + $0x8] sm:$0xff]  ;;  %v22_v61 = vld [vmem:[%s2221_s0 + $0x10] sm:$0xff]  ;;  %v23_v62 = vld [vmem:[%s2221_s0 + $0x18] sm:$0xff] }
   0x9   :  { %1709 = vmatpush3.bf16.msra.mxu0 %v1706_v7 }
   0xa   :  { %1711 = vmatprep.subr.bf16.mxu0 %v1710_v14  ;;  %1731 = vmatpush3.bf16.msra.mxu1 %v1957_v19 }
   0xb   :  { %1732 = vmatprep.subr.bf16.mxu1 %v1876_v3 }
   0xd   :  { %1713 = vmatpush3.bf16.msra.mxu0 %v1710_v14  ;;  %1591 = vmatmul.mubr.f32.vlgmr.msra.gmra.mrb[0].mxu1 %v1878_v4 }
   0xe   :  { %1715 = vmatprep.subr.bf16.mxu0 %v1714_v20  ;;  %1734 = vmatpush3.bf16.msra.mxu1 %v1939_v12 }
   0xf   :  { %1601 = vmatprep.mubr.msk.f32.mxu1 %vm1877_vm0, %v1878_v4  ;;  %1735 = vmatprep.subr.bf16.mxu1 %v1876_v3 }
  0x11   :  { %1717 = vmatpush3.bf16.msra.mxu0 %v1714_v20 }
  0x12   :  { %1719 = vmatprep.subr.bf16.mxu0 %v1718_v23  ;;  %1737 = vmatpush3.bf16.msra.mxu1 %v1957_v19 }
  0x13   :  { %1738 = vmatprep.subr.bf16.mxu1 %v1876_v3 }
  0x15   :  { %1721 = vmatpush3.bf16.msra.mxu0 %v1718_v23 }
  0x16   :  { %1723 = vmatprep.subr.bf16.mxu0 %v1722_v26 }
  0x19   :  { %1725 = vmatpush3.bf16.msra.mxu0 %v1722_v26 }
  0x1a   :  { %1568 = vmatprep.subr.mxu0 %v40_v27 }
  0x1d   :  { %1569 = vmatpush3.msra.mxu0 %v40_v27 }
  0x1e   :  { %1571 = vmatmul.mubr.msk.f32.vlgmr.msra.gmra.mrb[0].mxu0 %vm41_vm1, %v21_v28  ;;  %1756 = vmatprep.subr.bf16.mxu0 %v1876_v3 }
  0x1f   :  { %1758 = vmatpush3.bf16.msra.mxu0 %v1939_v12  ;;  %1573 = vmatprep.mubr.msk.f32.mxu0 %vm41_vm1, %v22_v61  ;;  %v26_v61 = vld [vmem:[%s2221_s0 + $0x30] sm:$0xff] }
  0x20   :  { %1759 = vmatprep.subr.bf16.mxu0 %v1876_v3 }
  0x22   :  { %1574 = vmatmul.mubr.msk.f32.gmra.mrb[2].mxu0 %vm41_vm1, %v23_v62  ;;  %v27_v62 = vld [vmem:[%s2221_s0 + $0x38] sm:$0xff] }
  0x23   :  { %1761 = vmatpush3.bf16.msra.mxu0 %v1957_v19 }
  0x24   :  { %1768 = vmatprep.subr.bf16.mxu0 %v1876_v3 }
  0xe0   :  { %v254_v29 = vpop.f32.mrb[0].mxu1 }
  0xe1   :  { %v1592_v30 = vpop.f32.mrb[1].mxu1 }
  0xf1   :  { %v1572_v31 = vpop.f32.mrb[0].mxu0 }
  0xf2   :  { %v132_v32 = vpop.f32.mrb[1].mxu0 }
  0xf3   :  { %v258_v33 = vadd.f32 %v254_v29, %v132_v32 }
  0xf5   :  { %1812 = vtanh.f32 %v258_v33  ;;  %v1431_v35 = vmul.f32 -1.442695, %v258_v33  ;;  %v1575_v2 = vpop.f32.mrb[2].mxu0 }
  0xf6   :  { %v142_v5 = vpop.f32.mrb[3].mxu0 }
  0xf7   :  { %1814 = vpow2.f32 %v1431_v35 }
  0xff   :  { %v1813_v34 = vpop.eup %1812 }
 0x100   :  { %268 = vrot.lane.b32.xlu0 %v1813_v34, %s1879_s1 }
 0x101   :  { %v1815_v36 = vpop.eup %1814 }
 0x102   :  { %v262_v37 = vadd.f32 1.0, %v1815_v36 }
 0x104   :  { %1816 = vrcp.f32 %v262_v37 }
 0x10e   :  { %v1817_v38 = vpop.eup %1816 }
 0x10f   :  { %v266_v41 = vmul.f32 0.0, %v1817_v38 }
 0x172   :  { %v269_v39 = vpop.permute.xlu0 %268 }
 0x173   :  { %v271_v40 = vmul.f32 %v1817_v38, %v269_v39  ;;  %v24_v39 = vld [vmem:[%s2221_s0 + $0x20] sm:$0xff] }
 0x174   :  { %1576 = vmatprep.mubr.msk.f32.mxu0 %vm41_vm1, %v24_v39 }
 0x175   :  { %273 = vrot.lane.b32.xlu0 %v271_v40, %s1879_s1  ;;  %v25_v40 = vld [vmem:[%s2221_s0 + $0x28] sm:$0xff] }
 0x176   :  { %1577 = vmatmul.mubr.msk.f32.gmra.mrb[4].mxu0 %vm41_vm1, %v25_v40 }
 0x177   :  { %1579 = vmatprep.mubr.msk.f32.mxu0 %vm41_vm1, %v26_v61 }
 0x17a   :  { %1580 = vmatmul.mubr.msk.f32.gmra.mrb[6].mxu0 %vm41_vm1, %v27_v62 }
 0x17b   :  { %1645 = vmatprep.mubr.msk.f32.mxu0 %vm1877_vm0, %v1878_v4 }
 0x1e7   :  { %v274_v42 = vpop.permute.xlu0 %273 }
 0x1e8   :  { %v276_v43 = vadd.f32 %v274_v42, %v266_v41 }
 0x1ea   :  { %1818 = vtanh.f32 %v276_v43 }
 0x1f4   :  { %v1819_v44 = vpop.eup %1818 }
 0x1f5   :  { %279 = vrot.lane.b32.xlu1 %v1819_v44, %s1879_s1 }
 0x249   :  { %v1578_v44 = vpop.f32.mrb[4].mxu0 }
 0x267   :  { %v280_v45 = vpop.permute.xlu1 %279 }
 0x268   :  { %v1997_v46 = vmul.f32 %v1817_v38, %v280_v45  ;;  %v152_v45 = vpop.f32.mrb[5].mxu0 }
 0x26a   :  { %284 = vrot.lane.b32.xlu1 %v1997_v46, %s1880_s30 }
 0x2dc   :  { %v285_v47 = vpop.permute.xlu1 %284 }
 0x2dd   :  { %288 = vst.msk [vmem:[#allocation3] sm:$0xff] %vm287_vm2, %v285_v47  ;;  %1602 = vmatmul.mubr.msk.f32.vlgmr.msra.gmra.mrb[2].mxu1 %vm184_vm3, %v285_v47 }
 0x2de   :  { %1740 = vmatpush3.bf16.msra.mxu1 %v1939_v12  ;;  %1612 = vmatprep.mubr.msk.f32.mxu1 %vm1877_vm0, %v1878_v4 }
 0x2df   :  { %1741 = vmatprep.subr.bf16.mxu1 %v1876_v3 }
 0x2e2   :  { %1743 = vmatpush3.bf16.msra.mxu1 %v1957_v19 }
 0x2e3   :  { %1744 = vmatprep.subr.bf16.mxu1 %v1876_v3 }
 0x3b0   :  { %v362_v48 = vpop.f32.mrb[2].mxu1 }
 0x3b1   :  { %v366_v49 = vadd.f32 %v1572_v31, %v362_v48  ;;  %v1603_v50 = vpop.f32.mrb[3].mxu1 }
 0x3b3   :  { %1820 = vtanh.f32 %v366_v49  ;;  %v1433_v52 = vmul.f32 -1.442695, %v366_v49 }
 0x3b5   :  { %1822 = vpow2.f32 %v1433_v52 }
 0x3bd   :  { %v1821_v51 = vpop.eup %1820 }
 0x3be   :  { %376 = vrot.lane.b32.xlu0 %v1821_v51, %s1879_s1 }
 0x3bf   :  { %v1823_v53 = vpop.eup %1822 }
 0x3c0   :  { %v370_v54 = vadd.f32 1.0, %v1823_v53 }
 0x3c2   :  { %1824 = vrcp.f32 %v370_v54 }
 0x3cc   :  { %v1825_v55 = vpop.eup %1824 }
 0x3cd   :  { %v374_v58 = vmul.f32 %v1825_v55, %v276_v43 }
 0x430   :  { %v377_v56 = vpop.permute.xlu0 %376 }
 0x431   :  { %v379_v57 = vmul.f32 %v1825_v55, %v377_v56 }
 0x433   :  { %381 = vrot.lane.b32.xlu1 %v379_v57, %s1879_s1 }
 0x4a5   :  { %v382_v59 = vpop.permute.xlu1 %381 }
 0x4a6   :  { %v384_v60 = vadd.f32 %v382_v59, %v374_v58 }
 0x4a8   :  { %1826 = vtanh.f32 %v384_v60 }
 0x4b2   :  { %v1827_v63 = vpop.eup %1826 }
 0x4b3   :  { %387 = vrot.lane.b32.xlu0 %v1827_v63, %s1879_s1 }
 0x525   :  { %v388_v0 = vpop.permute.xlu0 %387 }
 0x526   :  { %v2020_v1 = vmul.f32 %v1825_v55, %v388_v0 }
 0x528   :  { %392 = vrot.lane.b32.xlu1 %v2020_v1, %s1880_s30 }
 0x59a   :  { %v393_v6 = vpop.permute.xlu1 %392 }
 0x59b   :  { %395 = vst.msk [vmem:[#allocation3 + $0x8] sm:$0xff] %vm287_vm2, %v393_v6  ;;  %1613 = vmatmul.mubr.msk.f32.vlgmr.msra.gmra.mrb[4].mxu1 %vm184_vm3, %v393_v6 }
 0x59c   :  { %1746 = vmatpush3.bf16.msra.mxu1 %v1939_v12  ;;  %1623 = vmatprep.mubr.msk.f32.mxu1 %vm1877_vm0, %v1878_v4 }
 0x59d   :  { %1747 = vmatprep.subr.bf16.mxu1 %v1876_v3 }
 0x5a0   :  { %1749 = vmatpush3.bf16.msra.mxu1 %v1957_v19 }
 0x5a1   :  { %1750 = vmatprep.subr.bf16.mxu1 %v1876_v3 }
 0x66e   :  { %v469_v7 = vpop.f32.mrb[4].mxu1 }
 0x66f   :  { %v473_v8 = vadd.f32 %v469_v7, %v142_v5  ;;  %v1614_v9 = vpop.f32.mrb[5].mxu1  ;;  %v2086_v5 = vpop.f32.mrb[6].mxu0 }
 0x670   :  { %v162_v6 = vpop.f32.mrb[7].mxu0 }
 0x671   :  { %1828 = vtanh.f32 %v473_v8  ;;  %v1435_v11 = vmul.f32 -1.442695, %v473_v8 }
 0x673   :  { %1830 = vpow2.f32 %v1435_v11 }
 0x67b   :  { %v1829_v10 = vpop.eup %1828 }
 0x67c   :  { %483 = vrot.lane.b32.xlu0 %v1829_v10, %s1879_s1 }
 0x67d   :  { %v1831_v13 = vpop.eup %1830 }
 0x67e   :  { %v477_v14 = vadd.f32 1.0, %v1831_v13 }
 0x680   :  { %1832 = vrcp.f32 %v477_v14 }
 0x68a   :  { %v1833_v15 = vpop.eup %1832 }
 0x68b   :  { %v481_v18 = vmul.f32 %v1833_v15, %v384_v60 }
 0x6ee   :  { %v484_v16 = vpop.permute.xlu0 %483 }
 0x6ef   :  { %v486_v17 = vmul.f32 %v1833_v15, %v484_v16 }
 0x6f1   :  { %488 = vrot.lane.b32.xlu1 %v486_v17, %s1879_s1 }
 0x763   :  { %v489_v20 = vpop.permute.xlu1 %488 }
 0x764   :  { %v491_v21 = vadd.f32 %v489_v20, %v481_v18  ;;  %v1050_v20 = vld [vmem:[%s2222_s3] sm:$0xff] }
 0x766   :  { %1834 = vtanh.f32 %v491_v21 }
 0x770   :  { %v1835_v22 = vpop.eup %1834 }
 0x771   :  { %494 = vrot.lane.b32.xlu0 %v1835_v22, %s1879_s1 }
 0x7e3   :  { %v495_v23 = vpop.permute.xlu0 %494 }
 0x7e4   :  { %v2035_v24 = vmul.f32 %v1833_v15, %v495_v23 }
 0x7e6   :  { %499 = vrot.lane.b32.xlu1 %v2035_v24, %s1880_s30 }
 0x858   :  { %v500_v25 = vpop.permute.xlu1 %499 }
 0x859   :  { %502 = vst.msk [vmem:[#allocation3 + $0x10] sm:$0xff] %vm287_vm2, %v500_v25  ;;  %1624 = vmatmul.mubr.msk.f32.vlgmr.msra.gmra.mrb[6].mxu1 %vm184_vm3, %v500_v25 }
 0x85a   :  { %1752 = vmatpush3.bf16.msra.mxu1 %v1939_v12  ;;  %1634 = vmatprep.mubr.msk.f32.mxu1 %vm1877_vm0, %v1878_v4 }
 0x85b   :  { %1753 = vmatprep.subr.bf16.mxu1 %v1876_v3 }
 0x85e   :  { %1755 = vmatpush3.bf16.msra.mxu1 %v1957_v19 }
 0x85f   :  { %1762 = vmatprep.subr.bf16.mxu1 %v1876_v3 }
 0x92c   :  { %v576_v26 = vpop.f32.mrb[6].mxu1 }
 0x92d   :  { %v580_v27 = vadd.f32 %v1575_v2, %v576_v26  ;;  %v1625_v28 = vpop.f32.mrb[7].mxu1 }
 0x92e   :  { %v1043_v28 = vld [vmem:[#allocation3 + $0x8] sm:$0xff] }
 0x92f   :  { %1836 = vtanh.f32 %v580_v27  ;;  %v1437_v30 = vmul.f32 -1.442695, %v580_v27  ;;  %v1042_v27 = vld [vmem:[#allocation3] sm:$0xff] }
 0x931   :  { %1838 = vpow2.f32 %v1437_v30 }
 0x939   :  { %v1837_v29 = vpop.eup %1836 }
 0x93a   :  { %590 = vrot.lane.b32.xlu0 %v1837_v29, %s1879_s1  ;;  %v1044_v29 = vld [vmem:[#allocation3 + $0x10] sm:$0xff] }
 0x93b   :  { %v1839_v31 = vpop.eup %1838 }
 0x93c   :  { %v584_v32 = vadd.f32 1.0, %v1839_v31 }
 0x93e   :  { %1840 = vrcp.f32 %v584_v32 }
 0x948   :  { %v1841_v33 = vpop.eup %1840 }
 0x949   :  { %v588_v36 = vmul.f32 %v1841_v33, %v491_v21  ;;  %v1051_v21 = vld [vmem:[%s2222_s3 + $0x8] sm:$0xff] }
 0x94a   :  { %v1778_v22 = vpack.c.bf16 %v1051_v21, %v1050_v20 }
 0x9ac   :  { %v591_v34 = vpop.permute.xlu0 %590 }
 0x9ad   :  { %v593_v35 = vmul.f32 %v1841_v33, %v591_v34 }
 0x9af   :  { %595 = vrot.lane.b32.xlu1 %v593_v35, %s1879_s1 }
 0xa21   :  { %v596_v37 = vpop.permute.xlu1 %595 }
 0xa22   :  { %v598_v38 = vadd.f32 %v596_v37, %v588_v36 }
 0xa24   :  { %1842 = vtanh.f32 %v598_v38 }
 0xa2e   :  { %v1843_v41 = vpop.eup %1842 }
 0xa2f   :  { %601 = vrot.lane.b32.xlu0 %v1843_v41, %s1879_s1 }
 0xaa1   :  { %v602_v42 = vpop.permute.xlu0 %601 }
 0xaa2   :  { %v2058_v43 = vmul.f32 %v1841_v33, %v602_v42 }
 0xaa4   :  { %606 = vrot.lane.b32.xlu1 %v2058_v43, %s1880_s30 }
 0xb16   :  { %v607_v47 = vpop.permute.xlu1 %606 }
 0xb17   :  { %609 = vst.msk [vmem:[#allocation3 + $0x18] sm:$0xff] %vm287_vm2, %v607_v47  ;;  %1635 = vmatmul.mubr.msk.f32.vlgmr.msra.gmra.mrb[8].mxu1 %vm184_vm3, %v607_v47 }
 0xb18   :  { %1764 = vmatpush3.bf16.msra.mxu1 %v1939_v12  ;;  %1656 = vmatprep.mubr.msk.f32.mxu1 %vm1877_vm0, %v1878_v4 }
 0xb19   :  { %1765 = vmatprep.subr.bf16.mxu1 %v1876_v3 }
 0xb1c   :  { %1767 = vmatpush3.bf16.msra.mxu1 %v1957_v19 }
 0xb1d   :  { %1779 = vmatprep.subr.bf16.mxu1 %v1778_v22 }
 0xb1e   :  { %v1045_v30 = vld [vmem:[#allocation3 + $0x18] sm:$0xff] }
 0xbea   :  { %v683_v48 = vpop.f32.mrb[8].mxu1 }
 0xbeb   :  { %v687_v49 = vadd.f32 %v683_v48, %v152_v45  ;;  %v1636_v50 = vpop.f32.mrb[9].mxu1 }
 0xbed   :  { %1844 = vtanh.f32 %v687_v49  ;;  %v1439_v52 = vmul.f32 -1.442695, %v687_v49 }
 0xbef   :  { %1846 = vpow2.f32 %v1439_v52 }
 0xbf7   :  { %v1845_v51 = vpop.eup %1844 }
 0xbf8   :  { %697 = vrot.lane.b32.xlu0 %v1845_v51, %s1879_s1 }
 0xbf9   :  { %v1847_v53 = vpop.eup %1846 }
 0xbfa   :  { %v691_v54 = vadd.f32 1.0, %v1847_v53 }
 0xbfc   :  { %1848 = vrcp.f32 %v691_v54 }
 0xc06   :  { %v1849_v55 = vpop.eup %1848 }
 0xc07   :  { %v695_v58 = vmul.f32 %v1849_v55, %v598_v38 }
 0xc6a   :  { %v698_v56 = vpop.permute.xlu0 %697 }
 0xc6b   :  { %v700_v57 = vmul.f32 %v1849_v55, %v698_v56 }
 0xc6d   :  { %702 = vrot.lane.b32.xlu1 %v700_v57, %s1879_s1 }
 0xcdf   :  { %v703_v59 = vpop.permute.xlu1 %702 }
 0xce0   :  { %v705_v60 = vadd.f32 %v703_v59, %v695_v58 }
 0xce2   :  { %1850 = vtanh.f32 %v705_v60 }
 0xcec   :  { %v1851_v63 = vpop.eup %1850 }
 0xced   :  { %708 = vrot.lane.b32.xlu0 %v1851_v63, %s1879_s1 }
 0xd5f   :  { %v709_v0 = vpop.permute.xlu0 %708 }
 0xd60   :  { %v2082_v2 = vmul.f32 %v1849_v55, %v709_v0 }
 0xd62   :  { %713 = vrot.lane.b32.xlu1 %v2082_v2, %s1880_s30 }
 0xdd4   :  { %v714_v7 = vpop.permute.xlu1 %713 }
 0xdd5   :  { %716 = vst.msk [vmem:[#allocation3 + $0x20] sm:$0xff] %vm287_vm2, %v714_v7  ;;  %1646 = vmatmul.mubr.msk.f32.vlgmr.msra.gmra.mrb[8].mxu0 %vm184_vm3, %v714_v7 }
 0xdd6   :  { %1770 = vmatpush3.bf16.msra.mxu0 %v1939_v12  ;;  %1667 = vmatprep.mubr.msk.f32.mxu0 %vm1877_vm0, %v1878_v4 }
 0xdd7   :  { %1771 = vmatprep.subr.bf16.mxu0 %v1876_v3 }
 0xdda   :  { %1773 = vmatpush3.bf16.msra.mxu0 %v1957_v19 }
 0xddc   :  { %v1046_v31 = vld [vmem:[#allocation3 + $0x20] sm:$0xff] }
 0xea8   :  { %v790_v8 = vpop.f32.mrb[8].mxu0 }
 0xea9   :  { %v794_v9 = vadd.f32 %v1578_v44, %v790_v8  ;;  %v1647_v10 = vpop.f32.mrb[9].mxu0 }
 0xeab   :  { %1852 = vtanh.f32 %v794_v9  ;;  %v1441_v13 = vmul.f32 -1.442695, %v794_v9 }
 0xead   :  { %1854 = vpow2.f32 %v1441_v13 }
 0xeb5   :  { %v1853_v11 = vpop.eup %1852 }
 0xeb6   :  { %804 = vrot.lane.b32.xlu0 %v1853_v11, %s1879_s1 }
 0xeb7   :  { %v1855_v14 = vpop.eup %1854 }
 0xeb8   :  { %v798_v15 = vadd.f32 1.0, %v1855_v14  ;;  %v1060_v14 = vld [vmem:[%s2222_s3 + $0x10] sm:$0xff] }
 0xeba   :  { %1856 = vrcp.f32 %v798_v15  ;;  %v1061_v15 = vld [vmem:[%s2222_s3 + $0x18] sm:$0xff] }
 0xec4   :  { %v1857_v12 = vpop.eup %1856 }
 0xec5   :  { %v802_v3 = vmul.f32 %v1857_v12, %v705_v60 }
 0xf28   :  { %v805_v16 = vpop.permute.xlu0 %804 }
 0xf29   :  { %v807_v17 = vmul.f32 %v1857_v12, %v805_v16 }
 0xf2b   :  { %809 = vrot.lane.b32.xlu1 %v807_v17, %s1879_s1 }
 0xf9d   :  { %v810_v4 = vpop.permute.xlu1 %809 }
 0xf9e   :  { %v812_v19 = vadd.f32 %v810_v4, %v802_v3 }
 0xfa0   :  { %1858 = vtanh.f32 %v812_v19 }
 0xfaa   :  { %v1859_v18 = vpop.eup %1858 }
 0xfab   :  { %815 = vrot.lane.b32.xlu0 %v1859_v18, %s1879_s1 }
0x101d   :  { %v816_v23 = vpop.permute.xlu0 %815 }
0x101e   :  { %v2104_v25 = vmul.f32 %v1857_v12, %v816_v23  ;;  %v1774_v12 = vpack.c.bf16 %v1061_v15, %v1060_v14 }
0x1020   :  { %820 = vrot.lane.b32.xlu1 %v2104_v25, %s1880_s30  ;;  %1775 = vmatprep.subr.bf16.mxu0 %v1774_v12 }
0x1092   :  { %v821_v26 = vpop.permute.xlu1 %820 }
0x1093   :  { %823 = vst.msk [vmem:[#allocation3 + $0x28] sm:$0xff] %vm287_vm2, %v821_v26  ;;  %1657 = vmatmul.mubr.msk.f32.vlgmr.msra.gmra.mrb[10].mxu1 %vm184_vm3, %v821_v26 }
0x1094   :  { %1781 = vmatpush3.bf16.msra.mxu1 %v1778_v22  ;;  %1690 = vmatprep.mubr.msk.f32.mxu1 %vm287_vm2, %v1042_v27 }
0x1097   :  { %1691 = vmatmul.mubr.msk.f32.vlgmr.msra.gmra.mrb[12].mxu1 %vm287_vm2, %v1043_v28 }
0x1098   :  { %1693 = vmatprep.mubr.msk.f32.mxu1 %vm287_vm2, %v1044_v29 }
0x109a   :  { %v1047_v32 = vld [vmem:[#allocation3 + $0x28] sm:$0xff] }
0x109b   :  { %1694 = vmatmul.mubr.msk.f32.gmra.mrb[14].mxu1 %vm287_vm2, %v1045_v30 }
0x109c   :  { %1696 = vmatprep.mubr.msk.f32.mxu1 %vm287_vm2, %v1046_v31  ;;  %v1462_v31 = vld [vmem:[%s2223_s4] ss:$0 sm:$0xff] }
0x109f   :  { %1697 = vmatmul.mubr.msk.f32.gmra.mrb[16].mxu1 %vm287_vm2, %v1047_v32 }
0x1166   :  { %v897_v33 = vpop.f32.mrb[10].mxu1 }
0x1167   :  { %v901_v34 = vadd.f32 %v897_v33, %v162_v6  ;;  %v1658_v35 = vpop.f32.mrb[11].mxu1 }
0x1169   :  { %1860 = vtanh.f32 %v901_v34  ;;  %v1443_v44 = vmul.f32 -1.442695, %v901_v34 }
0x116a   :  { %v2116_v36 = vpop.f32.mrb[12].mxu1 }
0x116b   :  { %v2118_v37 = vpop.f32.mrb[13].mxu1  ;;  %1862 = vpow2.f32 %v1443_v44 }
0x116e   :  { %v2120_v38 = vpop.f32.mrb[14].mxu1 }
0x116f   :  { %v2122_v39 = vpop.f32.mrb[15].mxu1 }
0x1172   :  { %v2124_v40 = vpop.f32.mrb[16].mxu1 }
0x1173   :  { %v1861_v41 = vpop.eup %1860  ;;  %v2126_v42 = vpop.f32.mrb[17].mxu1 }
0x1174   :  { %911 = vrot.lane.b32.xlu0 %v1861_v41, %s1879_s1 }
0x1175   :  { %v1863_v45 = vpop.eup %1862 }
0x1176   :  { %v905_v47 = vadd.f32 1.0, %v1863_v45 }
0x1178   :  { %1864 = vrcp.f32 %v905_v47 }
0x1182   :  { %v1865_v48 = vpop.eup %1864 }
0x1183   :  { %v909_v51 = vmul.f32 %v1865_v48, %v812_v19 }
0x11e6   :  { %v912_v49 = vpop.permute.xlu0 %911 }
0x11e7   :  { %v914_v50 = vmul.f32 %v1865_v48, %v912_v49 }
0x11e9   :  { %916 = vrot.lane.b32.xlu1 %v914_v50, %s1879_s1 }
0x125b   :  { %v917_v52 = vpop.permute.xlu1 %916 }
0x125c   :  { %v919_v53 = vadd.f32 %v917_v52, %v909_v51 }
0x125e   :  { %1866 = vtanh.f32 %v919_v53 }
0x1268   :  { %v1867_v54 = vpop.eup %1866 }
0x1269   :  { %922 = vrot.lane.b32.xlu0 %v1867_v54, %s1879_s1 }
0x12db   :  { %v923_v55 = vpop.permute.xlu0 %922 }
0x12dc   :  { %v925_v56 = vmul.f32 %v1865_v48, %v923_v55 }
0x12de   :  { %927 = vrot.lane.b32.xlu1 %v925_v56, %s1880_s30 }
0x1350   :  { %v928_v57 = vpop.permute.xlu1 %927 }
0x1351   :  { %930 = vst.msk [vmem:[#allocation3 + $0x30] sm:$0xff] %vm287_vm2, %v928_v57  ;;  %1668 = vmatmul.mubr.msk.f32.vlgmr.msra.gmra.mrb[10].mxu0 %vm184_vm3, %v928_v57 }
0x1352   :  { %1777 = vmatpush3.bf16.msra.mxu0 %v1774_v12 }
0x1358   :  { %v1048_v58 = vld [vmem:[#allocation3 + $0x30] sm:$0xff] }
0x1359   :  { %1699 = vmatprep.mubr.msk.f32.mxu1 %vm287_vm2, %v1048_v58 }
0x1424   :  { %v1004_v59 = vpop.f32.mrb[10].mxu0 }
0x1425   :  { %v1008_v60 = vadd.f32 %v2086_v5, %v1004_v59  ;;  %v1669_v61 = vpop.f32.mrb[11].mxu0 }
0x1427   :  { %1868 = vtanh.f32 %v1008_v60  ;;  %v1445_v63 = vmul.f32 -1.442695, %v1008_v60 }
0x1429   :  { %1870 = vpow2.f32 %v1445_v63 }
0x1431   :  { %v1869_v62 = vpop.eup %1868 }
0x1432   :  { %1018 = vrot.lane.b32.xlu0 %v1869_v62, %s1879_s1 }
0x1433   :  { %v1871_v0 = vpop.eup %1870 }
0x1434   :  { %v1012_v6 = vadd.f32 1.0, %v1871_v0 }
0x1436   :  { %1872 = vrcp.f32 %v1012_v6 }
0x1440   :  { %v1873_v7 = vpop.eup %1872 }
0x1441   :  { %v1016_v10 = vmul.f32 %v1873_v7, %v919_v53 }
0x14a4   :  { %v1019_v8 = vpop.permute.xlu0 %1018 }
0x14a5   :  { %v1021_v9 = vmul.f32 %v1873_v7, %v1019_v8  ;;  %v1360_v8 = vlaneseq }
0x14a7   :  { %1023 = vrot.lane.b32.xlu1 %v1021_v9, %s1879_s1  ;;  %v1361_v9 = vand.u32 127, %v1360_v8 }
0x1519   :  { %v1024_v11 = vpop.permute.xlu1 %1023 }
0x151a   :  { %v1026_v13 = vadd.f32 %v1024_v11, %v1016_v10  ;;  %v1362_v10 = vcvt.s32.f32 %v1361_v9 }
0x151c   :  { %1874 = vtanh.f32 %v1026_v13 }
0x1526   :  { %v1875_v5 = vpop.eup %1874 }
0x1527   :  { %1029 = vrot.lane.b32.xlu0 %v1875_v5, %s1879_s1 }
0x152b   :  { %931 = vrot.lane.b32.xlu0 %v925_v56, %s1881_s20 }
0x152f   :  { %717 = vrot.lane.b32.xlu0 %v2082_v2, %s1881_s20 }
0x1533   :  { %503 = vrot.lane.b32.xlu0 %v2035_v24, %s1881_s20 }
0x1537   :  { %289 = vrot.lane.b32.xlu0 %v1997_v46, %s1881_s20 }
0x1599   :  { %v1030_v16 = vpop.permute.xlu0 %1029 }
0x159a   :  { %v1032_v17 = vmul.f32 %v1873_v7, %v1030_v16 }
0x159c   :  { %1038 = vrot.lane.b32.xlu1 %v1032_v17, %s1881_s20 }
0x159d   :  { %v932_v3 = vpop.permute.xlu0 %931 }
0x159e   :  { %934 = vst.msk [vmem:[#allocation4 + $0x8] sm:$0xff] %vm287_vm2, %v932_v3 }
0x15a0   :  { %824 = vrot.lane.b32.xlu1 %v2104_v25, %s1881_s20 }
0x15a1   :  { %v718_v46 = vpop.permute.xlu0 %717 }
0x15a2   :  { %720 = vst.msk [vmem:[#allocation4 + $0x18] sm:$0xff] %vm287_vm2, %v718_v46 }
0x15a4   :  { %610 = vrot.lane.b32.xlu1 %v2058_v43, %s1881_s20 }
0x15a5   :  { %v504_v24 = vpop.permute.xlu0 %503  ;;  %v1053_v43 = vld [vmem:[#allocation4 + $0x8] sm:$0xff] }
0x15a6   :  { %506 = vst.msk [vmem:[#allocation4 + $0x28] sm:$0xff] %vm287_vm2, %v504_v24 }
0x15a8   :  { %396 = vrot.lane.b32.xlu1 %v2020_v1, %s1881_s20 }
0x15a9   :  { %v290_v2 = vpop.permute.xlu0 %289  ;;  %v1055_v22 = vld [vmem:[#allocation4 + $0x18] sm:$0xff] }
0x15aa   :  { %292 = vst.msk [vmem:[#allocation4 + $0x38] sm:$0xff] %vm287_vm2, %v290_v2 }
0x15ac   :  { %1034 = vrot.lane.b32.xlu1 %v1032_v17, %s1880_s30 }
0x15ad   :  { %v1057_v26 = vld [vmem:[#allocation4 + $0x28] sm:$0xff] }
0x15b1   :  { %v1059_v28 = vld [vmem:[#allocation4 + $0x38] sm:$0xff] }
0x160e   :  { %v1039_v4 = vpop.permute.xlu1 %1038 }
0x160f   :  { %1041 = vst.msk [vmem:[#allocation4] sm:$0xff] %vm287_vm2, %v1039_v4 }
0x1612   :  { %v825_v19 = vpop.permute.xlu1 %824 }
0x1613   :  { %827 = vst.msk [vmem:[#allocation4 + $0x10] sm:$0xff] %vm287_vm2, %v825_v19 }
0x1616   :  { %v611_v18 = vpop.permute.xlu1 %610  ;;  %v1052_v20 = vld [vmem:[#allocation4] sm:$0xff] }
0x1617   :  { %613 = vst.msk [vmem:[#allocation4 + $0x20] sm:$0xff] %vm287_vm2, %v611_v18  ;;  %1674 = vmatprep.mubr.msk.f32.mxu0 %vm287_vm2, %v1052_v20 }
0x1618   :  { %1675 = vmatmul.mubr.msk.f32.vlgmr.msra.gmra.mrb[12].mxu0 %vm287_vm2, %v1053_v43 }
0x161a   :  { %v397_v1 = vpop.permute.xlu1 %396  ;;  %v1054_v21 = vld [vmem:[#allocation4 + $0x10] sm:$0xff] }
0x161b   :  { %399 = vst.msk [vmem:[#allocation4 + $0x30] sm:$0xff] %vm287_vm2, %v397_v1  ;;  %1677 = vmatprep.mubr.msk.f32.mxu0 %vm287_vm2, %v1054_v21 }
0x161c   :  { %1678 = vmatmul.mubr.msk.f32.gmra.mrb[14].mxu0 %vm287_vm2, %v1055_v22 }
0x161e   :  { %v1035_v23 = vpop.permute.xlu1 %1034  ;;  %v1056_v25 = vld [vmem:[#allocation4 + $0x20] sm:$0xff] }
0x161f   :  { %1037 = vst.msk [vmem:[#allocation3 + $0x38] sm:$0xff] %vm287_vm2, %v1035_v23  ;;  %1680 = vmatprep.mubr.msk.f32.mxu0 %vm287_vm2, %v1056_v25 }
0x1620   :  { %1681 = vmatmul.mubr.msk.f32.gmra.mrb[16].mxu0 %vm287_vm2, %v1057_v26 }
0x1622   :  { %v1058_v27 = vld [vmem:[#allocation4 + $0x30] sm:$0xff] }
0x1623   :  { %1683 = vmatprep.mubr.msk.f32.mxu0 %vm287_vm2, %v1058_v27 }
0x1624   :  { %1684 = vmatmul.mubr.msk.f32.gmra.mrb[18].mxu0 %vm287_vm2, %v1059_v28 }
0x1626   :  { %v1049_v29 = vld [vmem:[#allocation3 + $0x38] sm:$0xff] }
0x1627   :  { %1700 = vmatmul.mubr.msk.f32.gmra.mrb[18].mxu1 %vm287_vm2, %v1049_v29 }
0x16eb   :  { %v1676_v30 = vpop.f32.mrb[12].mxu0 }
0x16ec   :  { %v1287_v32 = vadd.f32 %v2116_v36, %v1676_v30  ;;  %v1152_v33 = vpop.f32.mrb[13].mxu0 }
0x16ed   :  { %v1282_v34 = vadd.f32 %v2118_v37, %v1152_v33 }
0x16ee   :  { %v1328_v35 = vadd.f32 %v1462_v31, %v1287_v32 }
0x16ef   :  { %v1679_v41 = vpop.f32.mrb[14].mxu0  ;;  %v1327_v44 = vadd.f32 %v1462_v31, %v1282_v34 }
0x16f0   :  { %v1297_v45 = vadd.f32 %v2120_v38, %v1679_v41  ;;  %v1162_v47 = vpop.f32.mrb[15].mxu0  ;;  %v1339_v48 = vsel %vm1335_vm4, %v1328_v35, -inf }
0x16f1   :  { %v1292_v49 = vadd.f32 %v2122_v39, %v1162_v47  ;;  %1340 = vmax.xlane.f32.xlu1 %v1339_v48  ;;  %v1336_v50 = vsel %vm1335_vm4, %v1327_v44, -inf }
0x16f2   :  { %1337 = vmax.xlane.f32.xlu0 %v1336_v50  ;;  %v1330_v51 = vadd.f32 %v1462_v31, %v1297_v45 }
0x16f3   :  { %v1682_v36 = vpop.f32.mrb[16].mxu0  ;;  %v1329_v55 = vadd.f32 %v1462_v31, %v1292_v49 }
0x16f4   :  { %v1307_v52 = vadd.f32 %v2124_v40, %v1682_v36  ;;  %v1172_v37 = vpop.f32.mrb[17].mxu0  ;;  %v1345_v53 = vsel %vm1335_vm4, %v1330_v51, -inf }
0x16f5   :  { %v1302_v54 = vadd.f32 %v2126_v42, %v1172_v37  ;;  %v1342_v39 = vsel %vm1335_vm4, %v1329_v55, -inf }
0x16f6   :  { %1346 = vmax.xlane.f32.xlu0 %v1345_v53  ;;  %v1332_v59 = vadd.f32 %v1462_v31, %v1307_v52 }
0x16f7   :  { %v1685_v38 = vpop.f32.mrb[18].mxu0  ;;  %v1331_v56 = vadd.f32 %v1462_v31, %v1302_v54 }
0x16f8   :  { %v1182_v57 = vpop.f32.mrb[19].mxu0  ;;  %v1351_v63 = vsel %vm1335_vm4, %v1332_v59, -inf }
0x16f9   :  { %v1348_v58 = vsel %vm1335_vm4, %v1331_v56, -inf }
0x16fa   :  { %v1701_v60 = vpop.f32.mrb[18].mxu1  ;;  %1343 = vmax.xlane.f32.xlu0 %v1342_v39  ;;  %1349 = vmax.xlane.f32.xlu1 %v1348_v58 }
0x16fb   :  { %v1317_v61 = vadd.f32 %v1701_v60, %v1685_v38  ;;  %v1311_v40 = vpop.f32.mrb[19].mxu1 }
0x16fc   :  { %v1312_v62 = vadd.f32 %v1311_v40, %v1182_v57 }
0x16fd   :  { %v1334_v0 = vadd.f32 %v1462_v31, %v1317_v61 }
0x16fe   :  { %1352 = vmax.xlane.f32.xlu0 %v1351_v63  ;;  %v1333_v42 = vadd.f32 %v1462_v31, %v1312_v62 }
0x16ff   :  { %v1357_v7 = vsel %vm1335_vm4, %v1334_v0, -inf }
0x1700   :  { %v1354_v6 = vsel %vm1335_vm4, %v1333_v42, -inf }
0x1701   :  { %1355 = vmax.xlane.f32.xlu1 %v1354_v6 }
0x1702   :  { %1358 = vmax.xlane.f32.xlu0 %v1357_v7 }
0x177e   :  { %v1341_v11 = vpop.xlane.xlu1 %1340 }
0x177f   :  { %vm1364_vm5 = vcmp.ge.f32.partialorder %v1328_v35, %v1341_v11  ;;  %v1338_v13 = vpop.xlane.xlu0 %1337 }
0x1780   :  { %vm1363_vm6 = vcmp.ge.f32.partialorder %v1327_v44, %v1338_v13  ;;  %v1372_v5 = vsel %vm1364_vm5, %v1362_v10, 8.0 }
0x1781   :  { %v1382_v14 = vsel %vm1335_vm4, %v1372_v5, inf  ;;  %v1371_v15 = vsel %vm1363_vm6, %v1362_v10, 8.0 }
0x1782   :  { %1383 = vmin.xlane.f32.xlu0 %v1382_v14  ;;  %v1379_v12 = vsel %vm1335_vm4, %v1371_v15, inf }
0x1783   :  { %v1347_v16 = vpop.xlane.xlu0 %1346  ;;  %1380 = vmin.xlane.f32.xlu1 %v1379_v12 }
0x1784   :  { %vm1366_vm7 = vcmp.ge.f32.partialorder %v1330_v51, %v1347_v16 }
0x1785   :  { %v1374_v17 = vsel %vm1366_vm7, %v1362_v10, 8.0 }
0x1786   :  { %v1388_v3 = vsel %vm1335_vm4, %v1374_v17, inf }
0x1787   :  { %v1344_v46 = vpop.xlane.xlu0 %1343  ;;  %v1350_v24 = vpop.xlane.xlu1 %1349  ;;  %1389 = vmin.xlane.f32.xlu0 %v1388_v3 }
0x1788   :  { %vm1365_vm8 = vcmp.ge.f32.partialorder %v1329_v55, %v1344_v46  ;;  %vm1367_vm9 = vcmp.ge.f32.partialorder %v1331_v56, %v1350_v24 }
0x1789   :  { %v1373_v2 = vsel %vm1365_vm8, %v1362_v10, 8.0  ;;  %v1375_v18 = vsel %vm1367_vm9, %v1362_v10, 8.0 }
0x178a   :  { %v1385_v4 = vsel %vm1335_vm4, %v1373_v2, inf  ;;  %v1391_v21 = vsel %vm1335_vm4, %v1375_v18, inf }
0x178b   :  { %v1353_v19 = vpop.xlane.xlu0 %1352  ;;  %1386 = vmin.xlane.f32.xlu1 %v1385_v4 }
0x178c   :  { %vm1368_vm10 = vcmp.ge.f32.partialorder %v1332_v59, %v1353_v19 }
0x178d   :  { %v1376_v20 = vsel %vm1368_vm10, %v1362_v10, 8.0 }
0x178e   :  { %v1356_v43 = vpop.xlane.xlu1 %1355  ;;  %v1394_v1 = vsel %vm1335_vm4, %v1376_v20, inf }
0x178f   :  { %vm1369_vm11 = vcmp.ge.f32.partialorder %v1333_v42, %v1356_v43  ;;  %1395 = vmin.xlane.f32.xlu0 %v1394_v1  ;;  %v1359_v22 = vpop.xlane.xlu0 %1358  ;;  %1392 = vmin.xlane.f32.xlu1 %v1391_v21 }
0x1790   :  { %vm1370_vm12 = vcmp.ge.f32.partialorder %v1334_v0, %v1359_v22  ;;  %v1377_v23 = vsel %vm1369_vm11, %v1362_v10, 8.0 }
0x1791   :  { %v1378_v25 = vsel %vm1370_vm12, %v1362_v10, 8.0  ;;  %v1397_v26 = vsel %vm1335_vm4, %v1377_v23, inf }
0x1792   :  { %v1400_v27 = vsel %vm1335_vm4, %v1378_v25, inf }
0x1793   :  { %1401 = vmin.xlane.f32.xlu0 %v1400_v27  ;;  %1398 = vmin.xlane.f32.xlu1 %v1397_v26 }
0x180f   :  { %v1384_v28 = vpop.xlane.xlu0 %1383 }
0x1810   :  { %v1792_v29 = vtrunc.f32 %v1384_v28  ;;  %v1381_v30 = vpop.xlane.xlu1 %1380 }
0x1811   :  { %v1790_v31 = vtrunc.f32 %v1381_v30 }
0x1812   :  { %v1793_v32 = vcvt.f32.s32 %v1792_v29 }
0x1813   :  { %v1791_v33 = vcvt.f32.s32 %v1790_v31 }
0x1814   :  { %1412 = vst [vmem:[%s2224_s5 + $0x8] sm:$0xff] %v1793_v32  ;;  %v1390_v34 = vpop.xlane.xlu0 %1389 }
0x1815   :  { %1411 = vst [vmem:[%s2224_s5] sm:$0xff] %v1791_v33  ;;  %v1796_v35 = vtrunc.f32 %v1390_v34 }
0x1817   :  { %v1797_v41 = vcvt.f32.s32 %v1796_v35 }
0x1818   :  { %v1387_v44 = vpop.xlane.xlu1 %1386 }
0x1819   :  { %1414 = vst [vmem:[%s2224_s5 + $0x18] sm:$0xff] %v1797_v41  ;;  %v1794_v45 = vtrunc.f32 %v1387_v44 }
0x181b   :  { %v1795_v47 = vcvt.f32.s32 %v1794_v45 }
0x181c   :  { %v1396_v48 = vpop.xlane.xlu0 %1395  ;;  %v1393_v49 = vpop.xlane.xlu1 %1392 }
0x181d   :  { %1413 = vst [vmem:[%s2224_s5 + $0x10] sm:$0xff] %v1795_v47  ;;  %v1800_v50 = vtrunc.f32 %v1396_v48  ;;  %v1798_v51 = vtrunc.f32 %v1393_v49 }
0x181f   :  { %v1801_v36 = vcvt.f32.s32 %v1800_v50  ;;  %v1799_v52 = vcvt.f32.s32 %v1798_v51 }
0x1820   :  { %v1402_v37 = vpop.xlane.xlu0 %1401  ;;  %v1399_v53 = vpop.xlane.xlu1 %1398 }
0x1821   :  { %1416 = vst [vmem:[%s2224_s5 + $0x28] sm:$0xff] %v1801_v36  ;;  %1415 = vst [vmem:[%s2224_s5 + $0x20] sm:$0xff] %v1799_v52  ;;  %v1804_v54 = vtrunc.f32 %v1402_v37  ;;  %v1802_v55 = vtrunc.f32 %v1399_v53 }
0x1823   :  { %v1805_v38 = vcvt.f32.s32 %v1804_v54  ;;  %v1803_v56 = vcvt.f32.s32 %v1802_v55 }
0x1825   :  { %1418 = vst [vmem:[%s2224_s5 + $0x38] sm:$0xff] %v1805_v38  ;;  %1417 = vst [vmem:[%s2224_s5 + $0x30] sm:$0xff] %v1803_v56 }

</bundles_post_ra>
